<compile_context>
chip_gen: v7x
topology: tpu7x:2x2x1
jax: 0.10.0
libtpu: 0.0.40
codegen_flags: <defaults>
</compile_context>

<pallas_src>
import functools
import math

import jax
import jax.numpy as jnp
import numpy as np
from jax import lax
from jax.experimental import pallas as pl
from jax.experimental.pallas import tpu as pltpu


# Conservative scoped-VMEM limit: per-step blocks here are only a few MiB, and
# 32 MiB leaves ample headroom on v7x's 64 MiB physical VMEM (review item).
_VMEM_LIMIT_BYTES = 32 * 1024 * 1024
# Budget for the upsample's double-buffered in+out row blocks.
_UP_BLOCK_BUDGET_BYTES = 8 * 1024 * 1024


# ---------------------------------------------------------------------------
# Kernel 1: depthwise bilinear "ConvTranspose2d" upsample (fill_up_weights).
# ---------------------------------------------------------------------------

def _bilinear_taps_np(f: int) -> np.ndarray:
    """1-D taps written by fill_up_weights() for kernel size 2f."""
    k = 2 * f
    fc = int(math.ceil(k / 2))
    c0 = (2 * fc - 1 - fc % 2) / (2.0 * fc)
    return np.array([1.0 - abs(a / fc - c0) for a in range(k)], dtype=np.float32)


def _convt_bilinear_matrix_np(in_size: int, f: int) -> np.ndarray:
    """(out, in) matrix of ConvTranspose1d(kernel=2f, stride=f, padding=f//2)
    with the fill_up_weights() bilinear taps (exact transposed-conv edges)."""
    k = 2 * f
    p = f // 2
    k1 = _bilinear_taps_np(f)
    out_size = (in_size - 1) * f - 2 * p + k
    m = np.zeros((out_size, in_size), dtype=np.float32)
    for o in range(out_size):
        for i in range(in_size):
            j = o - f * i + p
            if 0 <= j < k:
                m[o, i] = k1[j]
    return m


def _upsample_matmul_kernel(k_ref, x_ref, o_ref):
    # One lane-dense MXU matmul: (rows, H*W) @ (H*W, Hout*Wout).
    o_ref[...] = jnp.dot(x_ref[...], k_ref[...],
                         preferred_element_type=jnp.float32).astype(o_ref.dtype)


@functools.partial(jax.jit, static_argnames=("f",))
def dla_upsample(x: jnp.ndarray, f: int) -> jnp.ndarray:
    """Depthwise ConvTranspose2d(C, C, 2f, stride=f, padding=f//2, groups=C,
    bias=False) with fill_up_weights() -> fixed bilinear upsampling.
    x: (N, C, H, W) -> (N, C, f*H, f*W)."""
    n, c, h, w = x.shape
    mh = _convt_bilinear_matrix_np(h, f)            # (hout, h)
    mw = _convt_bilinear_matrix_np(w, f)            # (wout, w)
    hout, wout = mh.shape[0], mw.shape[0]

    # Combined 2-D interpolation operator on the flattened spatial dim:
    #   out[nc, ho*wout+wo] = sum_{hi,wi} x[nc, hi*w+wi] * Mh[ho,hi] * Mw[wo,wi]
    # TODO(synk): for large feature maps switch back to a separable / 2-tap
    # formulation; the dense kron operator only targets small pyramid levels.
    kmat = jnp.asarray(np.kron(mh, mw).T, dtype=x.dtype)    # (h*w, hout*wout)

    nc, hw, howo = n * c, h * w, hout * wout
    x_flat = x.reshape(nc, hw)                      # free row-major reshape of NCHW

    # Row-block over the N*C planes: >=2 grid steps (v7x has 2 TensorCores),
    # capped by a VMEM budget (incl. double buffering of in/out blocks).
    row_blk = nc
    if nc % 16 == 0:
        row_blk = nc // 2
    bytes_per_row = 2 * (hw + howo) * x.dtype.itemsize
    max_rows = max(8, _UP_BLOCK_BUDGET_BYTES // max(1, bytes_per_row))
    while row_blk > max_rows and row_blk % 16 == 0:
        row_blk //= 2
    grid = nc // row_blk

    out_flat = pl.pallas_call(
        _upsample_matmul_kernel,
        out_shape=jax.ShapeDtypeStruct((nc, howo), x.dtype),
        grid_spec=pltpu.PrefetchScalarGridSpec(
            num_scalar_prefetch=0,
            grid=(grid,),
            in_specs=[
                pl.BlockSpec((hw, howo), lambda i: (0, 0)),       # interp operator, resident
                pl.BlockSpec((row_blk, hw), lambda i: (i, 0)),    # plane rows
            ],
            out_specs=pl.BlockSpec((row_blk, howo), lambda i: (i, 0)),  # lane-dense stores
        ),
        compiler_params=pltpu.CompilerParams(
            dimension_semantics=("parallel",),
            vmem_limit_bytes=_VMEM_LIMIT_BYTES,
        ),
    )(kmat, x_flat)
    return out_flat.reshape(n, c, hout, wout)


# ---------------------------------------------------------------------------
# Kernel 2: conv3x3 (3x3, stride 1, pad 1, no bias) with in-kernel im2col and
# optional fused residual add (node convs compute conv(x + skip)).
# ---------------------------------------------------------------------------

def _conv_tap_masks_np(h: int, w: int) -> np.ndarray:
    """(9, 1, h*w) {0,1} masks: tap t = ky*3+kx is valid at flat position
    p = hh*w+ww iff source (hh+ky-1, ww+kx-1) lies inside the image."""
    masks = np.zeros((9, 1, h * w), dtype=np.float32)
    t = 0
    for oy in (-1, 0, 1):
        for ox in (-1, 0, 1):
            for p in range(h * w):
                hh, ww = divmod(p, w)
                if 0 <= hh + oy < h and 0 <= ww + ox < w:
                    masks[t, 0, p] = 1.0
            t += 1
    return masks


def _shift_lanes(x, d):
    """xs[:, p] = x[:, p + d], zero-filled where p + d falls outside [0, n)."""
    if d == 0:
        return x
    n = x.shape[1]
    z = jnp.zeros((x.shape[0], abs(d)), x.dtype)
    if d > 0:
        return jnp.concatenate([x[:, d:], z], axis=1)
    return jnp.concatenate([z, x[:, :n + d]], axis=1)


def _conv3x3_kernel(w_ref, m_ref, x_ref, *rest, width, has_residual):
    if has_residual:
        res_ref, o_ref = rest
    else:
        (o_ref,) = rest

    x = x_ref[0]                                    # (Cin, H*W), lane-dense
    if has_residual:
        x = x + res_ref[0]                          # fused skip add (node convs)

    cout = w_ref.shape[1]
    hw = x.shape[1]
    acc = jnp.zeros((cout, hw), jnp.float32)
    t = 0
    for oy in (-1, 0, 1):
        for ox in (-1, 0, 1):
            # In-kernel im2col tap: spatial shift along the flattened lane dim,
            # boundary-masked, then one (Cout,Cin)@(Cin,HW) MXU matmul.
            xs = _shift_lanes(x, oy * width + ox) * m_ref[t]
            acc = acc + jnp.dot(w_ref[t], xs, preferred_element_type=jnp.float32)
            t += 1
    o_ref[0] = acc.astype(o_ref.dtype)


@jax.jit
def conv3x3(x: jnp.ndarray, weight: jnp.ndarray, residual=None) -> jnp.ndarray:
    """PyTorch conv3x3: Conv2d(cin, cout, 3, stride=1, padding=1, bias=False),
    optionally fused with a preceding residual add: conv(x + residual).
    x: (N, Cin, H, W), weight: (Cout, Cin, 3, 3)."""
    n, cin, h, w = x.shape
    cout = weight.shape[0]
    hw = h * w

    w_taps = jnp.transpose(weight, (2, 3, 0, 1)).reshape(9, cout, cin)  # tiny
    masks = jnp.asarray(_conv_tap_masks_np(h, w), dtype=x.dtype)
    x_flat = x.reshape(n, cin, hw)                  # free row-major reshape

    args = [w_taps, masks, x_flat]
    in_specs = [
        pl.BlockSpec((9, cout, cin), lambda i: (0, 0, 0)),   # per-tap weights, resident
        pl.BlockSpec((9, 1, hw), lambda i: (0, 0, 0)),       # boundary masks, resident
        pl.BlockSpec((1, cin, hw), lambda i: (i, 0, 0)),     # one image per grid step
    ]
    if residual is not None:
        args.append(residual.reshape(n, cin, hw))
        in_specs.append(pl.BlockSpec((1, cin, hw), lambda i: (i, 0, 0)))

    out = pl.pallas_call(
        functools.partial(_conv3x3_kernel, width=w,
                          has_residual=residual is not None),
        out_shape=jax.ShapeDtypeStruct((n, cout, hw), x.dtype),
        grid_spec=pltpu.PrefetchScalarGridSpec(
            num_scalar_prefetch=0,
            grid=(n,),                              # >=2 steps (batch), 'parallel'
            in_specs=in_specs,
            out_specs=pl.BlockSpec((1, cout, hw), lambda i: (i, 0, 0)),
        ),
        compiler_params=pltpu.CompilerParams(
            dimension_semantics=("parallel",),
            vmem_limit_bytes=_VMEM_LIMIT_BYTES,
        ),
    )(*args)
    # TODO(synk): for large feature maps tile H*W (and K=Cin) inside the grid
    # instead of holding one whole image per step.
    return out.reshape(n, cout, h, w)


# ---------------------------------------------------------------------------
# Pure-JAX references (only for the correctness check).
# ---------------------------------------------------------------------------

def conv3x3_ref(x, weight, residual=None):
    if residual is not None:
        x = x + residual
    return lax.conv_general_dilated(
        x, weight, window_strides=(1, 1), padding=((1, 1), (1, 1)),
        dimension_numbers=("NCHW", "OIHW", "NCHW"),
        precision=lax.Precision.HIGHEST)


def dla_upsample_ref(x, f):
    n, c, h, w = x.shape
    k = 2 * f
    p = f // 2
    k1 = _bilinear_taps_np(f)
    w_dw = jnp.asarray(np.tile(np.outer(k1, k1)[None, None], (c, 1, 1, 1)),
                       dtype=x.dtype)               # (C, 1, 2f, 2f)
    # ConvTranspose2d(stride=f, padding=p) == conv over the f-dilated input with
    # padding (k-1-p); the bilinear kernel is symmetric so no spatial flip.
    return lax.conv_general_dilated(
        x, w_dw, window_strides=(1, 1),
        padding=((k - 1 - p, k - 1 - p), (k - 1 - p, k - 1 - p)),
        lhs_dilation=(f, f),
        dimension_numbers=("NCHW", "OIHW", "NCHW"),
        feature_group_count=c,
        precision=lax.Precision.HIGHEST)


# ---------------------------------------------------------------------------
# IDAUp / DLAUp / DLA_Backbone head: parameters + forward, mirroring PyTorch.
# conv_fn / up_fn select the Pallas or pure-JAX reference ops.
# ---------------------------------------------------------------------------

def _init_conv3x3_weight(key, cin, cout):
    std = 1.0 / math.sqrt(9 * cin)
    return std * jax.random.normal(key, (cout, cin, 3, 3), dtype=jnp.float32)


def make_idaup_params(key, o, channels, up_f):
    params = {}
    for i in range(1, len(channels)):
        key, kp, kn = jax.random.split(key, 3)
        params[f"proj_{i}"] = _init_conv3x3_weight(kp, channels[i], o)
        params[f"node_{i}"] = _init_conv3x3_weight(kn, o, o)
        params[f"up_f_{i}"] = int(up_f[i])
    return params, key


def idaup_forward(params, layers, startp, endp, conv_fn, up_fn):
    layers = list(layers)
    for i in range(startp + 1, endp):
        j = i - startp
        t = conv_fn(layers[i], params[f"proj_{j}"])
        t = up_fn(t, f=params[f"up_f_{j}"])
        # node(upsample(proj(x)) + skip): the skip add is fused into the kernel.
        layers[i] = conv_fn(t, params[f"node_{j}"], residual=layers[i - 1])
    return layers


def make_dlaup_params(key, startp, channels, scales):
    channels = list(channels)
    in_channels = list(channels)
    scales = np.array(scales, dtype=int)
    params = {"startp": startp}
    for i in range(len(channels) - 1):
        j = -i - 2
        ida, key = make_idaup_params(key, channels[j], in_channels[j:],
                                     list(scales[j:] // scales[j]))
        params[f"ida_{i}"] = ida
        scales[j + 1:] = scales[j]
        in_channels[j + 1:] = [channels[j] for _ in channels[j + 1:]]
    return params, key


def dlaup_forward(params, layers, conv_fn, up_fn):
    layers = list(layers)
    out = [layers[-1]]
    for i in range(len(layers) - params["startp"] - 1):
        layers = idaup_forward(params[f"ida_{i}"], layers,
                               len(layers) - i - 2, len(layers), conv_fn, up_fn)
        out.insert(0, layers[-1])
    return out


def make_dla_backbone_params(key, channels, down_ratio, last_level, out_channel=0):
    assert down_ratio in [2, 4, 8, 16]
    first_level = int(np.log2(down_ratio))
    scales = [2 ** i for i in range(len(channels[first_level:]))]
    dla_up, key = make_dlaup_params(key, first_level, channels[first_level:], scales)
    if out_channel == 0:
        out_channel = channels[first_level]
    ida_up, key = make_idaup_params(
        key, out_channel, channels[first_level:last_level],
        [2 ** i for i in range(last_level - first_level)])
    return {"first_level": first_level, "last_level": last_level,
            "dla_up": dla_up, "ida_up": ida_up}, key


def dla_backbone_forward(params, base_feats, conv_fn, up_fn):
    # TODO(synk): `self.base = globals()[base_name](...)` (the DLA trunk) is not
    # defined in the provided spec; `base_feats` stands in for `self.base(x)`.
    x_base = list(base_feats)
    x = dlaup_forward(params["dla_up"], base_feats, conv_fn, up_fn)
    y = [x[i] for i in range(params["last_level"] - params["first_level"])]
    y = idaup_forward(params["ida_up"], y, 0, len(y), conv_fn, up_fn)
    return x_base, y


if __name__ == "__main__":
    key = jax.random.PRNGKey(0)

    # Small DLA-style pyramid: 4 levels at strides 1 / 2 / 4 / 8 of a 32x32 map.
    channels = [16, 32, 64, 128]
    base_spatial = 32
    batch = 2
    down_ratio = 2       # first_level = 1
    last_level = 3

    feats = []
    for lvl, ch in enumerate(channels):
        key, k = jax.random.split(key)
        s = base_spatial // (2 ** lvl)
        feats.append(jax.random.normal(k, (batch, ch, s, s), dtype=jnp.float32))

    params, key = make_dla_backbone_params(key, channels, down_ratio, last_level)

    x_base, y = dla_backbone_forward(params, feats, conv3x3, dla_upsample)
    y = jax.block_until_ready(y)

    assert len(y) == last_level - int(np.log2(down_ratio))
    for t in y:
        assert t.shape == (batch, channels[1], base_spatial // 2, base_spatial // 2), t.shape

    # Correctness check against a pure-JAX (lax.conv_general_dilated) head.
    _, y_ref = dla_backbone_forward(params, feats, conv3x3_ref, dla_upsample_ref)
    for a, b in zip(y, y_ref):
        err = float(jnp.max(jnp.abs(a - b)))
        assert jnp.allclose(a, b, atol=1e-3, rtol=1e-3), err
    assert all(a is b for a, b in zip(x_base, feats))

    print("KERNEL_OK")
</pallas_src>

<mosaic_0001>
module attributes {stable_mosaic.version = 11 : i64} {
  func.func @_conv3x3_kernel(%arg0: i32, %arg1: memref<9x64x128xf32, #tpu.memory_space<vmem>>, %arg2: memref<9x1x16xf32, #tpu.memory_space<vmem>>, %arg3: memref<1x128x16xf32, #tpu.memory_space<vmem>>, %arg4: memref<1x64x16xf32, #tpu.memory_space<vmem>>) attributes {dimension_semantics = [#tpu.dimension_semantics<parallel>], iteration_bounds = array<i64: 2>, scalar_prefetch = 0 : i64, scratch_operands = 0 : i64, tpu.core_type = #tpu.core_type<tc>, window_params = [{pipeline_mode = #tpu.pipeline_mode<synchronous>, transform_indices = @transform_0, window_bounds = array<i64: 9, 64, 128>}, {pipeline_mode = #tpu.pipeline_mode<synchronous>, transform_indices = @transform_1, window_bounds = array<i64: 9, 1, 16>}, {transform_indices = @transform_2, window_bounds = array<i64: 1, 128, 16>}, {transform_indices = @transform_3, window_bounds = array<i64: 1, 64, 16>}]} {
    %c0 = arith.constant 0 : index
    %c0_0 = arith.constant 0 : index
    %c0_1 = arith.constant 0 : index
    %0 = vector.load %arg3[%c0, %c0_0, %c0_1] : memref<1x128x16xf32, #tpu.memory_space<vmem>>, vector<1x128x16xf32>
    %1 = vector.shape_cast %0 : vector<1x128x16xf32> to vector<128x16xf32>
    %cst = arith.constant 0.000000e+00 : f32
    %2 = vector.broadcast %cst : f32 to vector<64x16xf32>
    %cst_2 = arith.constant 0.000000e+00 : f32
    %3 = vector.broadcast %cst_2 : f32 to vector<128x5xf32>
    %4 = vector.extract_strided_slice %1 {offsets = [0, 0], sizes = [128, 11], strides = [1, 1]} : vector<128x16xf32> to vector<128x11xf32>
    %5 = tpu.concatenate %3, %4 in 1 : vector<128x5xf32>, vector<128x11xf32> -> vector<128x16xf32>
    %c0_3 = arith.constant 0 : index
    %c0_4 = arith.constant 0 : index
    %c0_5 = arith.constant 0 : index
    %6 = vector.load %arg2[%c0_3, %c0_4, %c0_5] : memref<9x1x16xf32, #tpu.memory_space<vmem>>, vector<1x1x16xf32>
    %7 = vector.shape_cast %6 : vector<1x1x16xf32> to vector<1x16xf32>
    %8 = vector.broadcast %7 : vector<1x16xf32> to vector<128x16xf32>
    %9 = arith.mulf %5, %8 : vector<128x16xf32>
    %c0_6 = arith.constant 0 : index
    %c0_7 = arith.constant 0 : index
    %c0_8 = arith.constant 0 : index
    %10 = vector.load %arg1[%c0_6, %c0_7, %c0_8] : memref<9x64x128xf32, #tpu.memory_space<vmem>>, vector<1x64x128xf32>
    %11 = vector.shape_cast %10 : vector<1x64x128xf32> to vector<64x128xf32>
    %cst_9 = arith.constant dense<0.000000e+00> : vector<64x16xf32>
    %12 = tpu.matmul %11, %9, %cst_9 {dimension_numbers = #tpu.dot_dimension_numbers<[1], [0], [0], [1], [0, 0, 1, 1], [], []>} : vector<64x128xf32>, vector<128x16xf32>, vector<64x16xf32> -> vector<64x16xf32>
    %13 = arith.addf %2, %12 : vector<64x16xf32>
    %cst_10 = arith.constant 0.000000e+00 : f32
    %14 = vector.broadcast %cst_10 : f32 to vector<128x4xf32>
    %15 = vector.extract_strided_slice %1 {offsets = [0, 0], sizes = [128, 12], strides = [1, 1]} : vector<128x16xf32> to vector<128x12xf32>
    %16 = tpu.concatenate %14, %15 in 1 : vector<128x4xf32>, vector<128x12xf32> -> vector<128x16xf32>
    %c1 = arith.constant 1 : index
    %c0_11 = arith.constant 0 : index
    %c0_12 = arith.constant 0 : index
    %17 = vector.load %arg2[%c1, %c0_11, %c0_12] : memref<9x1x16xf32, #tpu.memory_space<vmem>>, vector<1x1x16xf32>
    %18 = vector.shape_cast %17 : vector<1x1x16xf32> to vector<1x16xf32>
    %19 = vector.broadcast %18 : vector<1x16xf32> to vector<128x16xf32>
    %20 = arith.mulf %16, %19 : vector<128x16xf32>
    %c1_13 = arith.constant 1 : index
    %c0_14 = arith.constant 0 : index
    %c0_15 = arith.constant 0 : index
    %21 = vector.load %arg1[%c1_13, %c0_14, %c0_15] : memref<9x64x128xf32, #tpu.memory_space<vmem>>, vector<1x64x128xf32>
    %22 = vector.shape_cast %21 : vector<1x64x128xf32> to vector<64x128xf32>
    %cst_16 = arith.constant dense<0.000000e+00> : vector<64x16xf32>
    %23 = tpu.matmul %22, %20, %cst_16 {dimension_numbers = #tpu.dot_dimension_numbers<[1], [0], [0], [1], [0, 0, 1, 1], [], []>} : vector<64x128xf32>, vector<128x16xf32>, vector<64x16xf32> -> vector<64x16xf32>
    %24 = arith.addf %13, %23 : vector<64x16xf32>
    %cst_17 = arith.constant 0.000000e+00 : f32
    %25 = vector.broadcast %cst_17 : f32 to vector<128x3xf32>
    %26 = vector.extract_strided_slice %1 {offsets = [0, 0], sizes = [128, 13], strides = [1, 1]} : vector<128x16xf32> to vector<128x13xf32>
    %27 = tpu.concatenate %25, %26 in 1 : vector<128x3xf32>, vector<128x13xf32> -> vector<128x16xf32>
    %c2 = arith.constant 2 : index
    %c0_18 = arith.constant 0 : index
    %c0_19 = arith.constant 0 : index
    %28 = vector.load %arg2[%c2, %c0_18, %c0_19] : memref<9x1x16xf32, #tpu.memory_space<vmem>>, vector<1x1x16xf32>
    %29 = vector.shape_cast %28 : vector<1x1x16xf32> to vector<1x16xf32>
    %30 = vector.broadcast %29 : vector<1x16xf32> to vector<128x16xf32>
    %31 = arith.mulf %27, %30 : vector<128x16xf32>
    %c2_20 = arith.constant 2 : index
    %c0_21 = arith.constant 0 : index
    %c0_22 = arith.constant 0 : index
    %32 = vector.load %arg1[%c2_20, %c0_21, %c0_22] : memref<9x64x128xf32, #tpu.memory_space<vmem>>, vector<1x64x128xf32>
    %33 = vector.shape_cast %32 : vector<1x64x128xf32> to vector<64x128xf32>
    %cst_23 = arith.constant dense<0.000000e+00> : vector<64x16xf32>
    %34 = tpu.matmul %33, %31, %cst_23 {dimension_numbers = #tpu.dot_dimension_numbers<[1], [0], [0], [1], [0, 0, 1, 1], [], []>} : vector<64x128xf32>, vector<128x16xf32>, vector<64x16xf32> -> vector<64x16xf32>
    %35 = arith.addf %24, %34 : vector<64x16xf32>
    %cst_24 = arith.constant 0.000000e+00 : f32
    %36 = vector.broadcast %cst_24 : f32 to vector<128x1xf32>
    %37 = vector.extract_strided_slice %1 {offsets = [0, 0], sizes = [128, 15], strides = [1, 1]} : vector<128x16xf32> to vector<128x15xf32>
    %38 = tpu.concatenate %36, %37 in 1 : vector<128x1xf32>, vector<128x15xf32> -> vector<128x16xf32>
    %c3 = arith.constant 3 : index
    %c0_25 = arith.constant 0 : index
    %c0_26 = arith.constant 0 : index
    %39 = vector.load %arg2[%c3, %c0_25, %c0_26] : memref<9x1x16xf32, #tpu.memory_space<vmem>>, vector<1x1x16xf32>
    %40 = vector.shape_cast %39 : vector<1x1x16xf32> to vector<1x16xf32>
    %41 = vector.broadcast %40 : vector<1x16xf32> to vector<128x16xf32>
    %42 = arith.mulf %38, %41 : vector<128x16xf32>
    %c3_27 = arith.constant 3 : index
    %c0_28 = arith.constant 0 : index
    %c0_29 = arith.constant 0 : index
    %43 = vector.load %arg1[%c3_27, %c0_28, %c0_29] : memref<9x64x128xf32, #tpu.memory_space<vmem>>, vector<1x64x128xf32>
    %44 = vector.shape_cast %43 : vector<1x64x128xf32> to vector<64x128xf32>
    %cst_30 = arith.constant dense<0.000000e+00> : vector<64x16xf32>
    %45 = tpu.matmul %44, %42, %cst_30 {dimension_numbers = #tpu.dot_dimension_numbers<[1], [0], [0], [1], [0, 0, 1, 1], [], []>} : vector<64x128xf32>, vector<128x16xf32>, vector<64x16xf32> -> vector<64x16xf32>
    %46 = arith.addf %35, %45 : vector<64x16xf32>
    %c4 = arith.constant 4 : index
    %c0_31 = arith.constant 0 : index
    %c0_32 = arith.constant 0 : index
    %47 = vector.load %arg2[%c4, %c0_31, %c0_32] : memref<9x1x16xf32, #tpu.memory_space<vmem>>, vector<1x1x16xf32>
    %48 = vector.shape_cast %47 : vector<1x1x16xf32> to vector<1x16xf32>
    %49 = vector.broadcast %48 : vector<1x16xf32> to vector<128x16xf32>
    %50 = arith.mulf %1, %49 : vector<128x16xf32>
    %c4_33 = arith.constant 4 : index
    %c0_34 = arith.constant 0 : index
    %c0_35 = arith.constant 0 : index
    %51 = vector.load %arg1[%c4_33, %c0_34, %c0_35] : memref<9x64x128xf32, #tpu.memory_space<vmem>>, vector<1x64x128xf32>
    %52 = vector.shape_cast %51 : vector<1x64x128xf32> to vector<64x128xf32>
    %cst_36 = arith.constant dense<0.000000e+00> : vector<64x16xf32>
    %53 = tpu.matmul %52, %50, %cst_36 {dimension_numbers = #tpu.dot_dimension_numbers<[1], [0], [0], [1], [0, 0, 1, 1], [], []>} : vector<64x128xf32>, vector<128x16xf32>, vector<64x16xf32> -> vector<64x16xf32>
    %54 = arith.addf %46, %53 : vector<64x16xf32>
    %cst_37 = arith.constant 0.000000e+00 : f32
    %55 = vector.broadcast %cst_37 : f32 to vector<128x1xf32>
    %56 = vector.extract_strided_slice %1 {offsets = [0, 1], sizes = [128, 15], strides = [1, 1]} : vector<128x16xf32> to vector<128x15xf32>
    %57 = tpu.concatenate %56, %55 in 1 : vector<128x15xf32>, vector<128x1xf32> -> vector<128x16xf32>
    %c5 = arith.constant 5 : index
    %c0_38 = arith.constant 0 : index
    %c0_39 = arith.constant 0 : index
    %58 = vector.load %arg2[%c5, %c0_38, %c0_39] : memref<9x1x16xf32, #tpu.memory_space<vmem>>, vector<1x1x16xf32>
    %59 = vector.shape_cast %58 : vector<1x1x16xf32> to vector<1x16xf32>
    %60 = vector.broadcast %59 : vector<1x16xf32> to vector<128x16xf32>
    %61 = arith.mulf %57, %60 : vector<128x16xf32>
    %c5_40 = arith.constant 5 : index
    %c0_41 = arith.constant 0 : index
    %c0_42 = arith.constant 0 : index
    %62 = vector.load %arg1[%c5_40, %c0_41, %c0_42] : memref<9x64x128xf32, #tpu.memory_space<vmem>>, vector<1x64x128xf32>
    %63 = vector.shape_cast %62 : vector<1x64x128xf32> to vector<64x128xf32>
    %cst_43 = arith.constant dense<0.000000e+00> : vector<64x16xf32>
    %64 = tpu.matmul %63, %61, %cst_43 {dimension_numbers = #tpu.dot_dimension_numbers<[1], [0], [0], [1], [0, 0, 1, 1], [], []>} : vector<64x128xf32>, vector<128x16xf32>, vector<64x16xf32> -> vector<64x16xf32>
    %65 = arith.addf %54, %64 : vector<64x16xf32>
    %cst_44 = arith.constant 0.000000e+00 : f32
    %66 = vector.broadcast %cst_44 : f32 to vector<128x3xf32>
    %67 = vector.extract_strided_slice %1 {offsets = [0, 3], sizes = [128, 13], strides = [1, 1]} : vector<128x16xf32> to vector<128x13xf32>
    %68 = tpu.concatenate %67, %66 in 1 : vector<128x13xf32>, vector<128x3xf32> -> vector<128x16xf32>
    %c6 = arith.constant 6 : index
    %c0_45 = arith.constant 0 : index
    %c0_46 = arith.constant 0 : index
    %69 = vector.load %arg2[%c6, %c0_45, %c0_46] : memref<9x1x16xf32, #tpu.memory_space<vmem>>, vector<1x1x16xf32>
    %70 = vector.shape_cast %69 : vector<1x1x16xf32> to vector<1x16xf32>
    %71 = vector.broadcast %70 : vector<1x16xf32> to vector<128x16xf32>
    %72 = arith.mulf %68, %71 : vector<128x16xf32>
    %c6_47 = arith.constant 6 : index
    %c0_48 = arith.constant 0 : index
    %c0_49 = arith.constant 0 : index
    %73 = vector.load %arg1[%c6_47, %c0_48, %c0_49] : memref<9x64x128xf32, #tpu.memory_space<vmem>>, vector<1x64x128xf32>
    %74 = vector.shape_cast %73 : vector<1x64x128xf32> to vector<64x128xf32>
    %cst_50 = arith.constant dense<0.000000e+00> : vector<64x16xf32>
    %75 = tpu.matmul %74, %72, %cst_50 {dimension_numbers = #tpu.dot_dimension_numbers<[1], [0], [0], [1], [0, 0, 1, 1], [], []>} : vector<64x128xf32>, vector<128x16xf32>, vector<64x16xf32> -> vector<64x16xf32>
    %76 = arith.addf %65, %75 : vector<64x16xf32>
    %cst_51 = arith.constant 0.000000e+00 : f32
    %77 = vector.broadcast %cst_51 : f32 to vector<128x4xf32>
    %78 = vector.extract_strided_slice %1 {offsets = [0, 4], sizes = [128, 12], strides = [1, 1]} : vector<128x16xf32> to vector<128x12xf32>
    %79 = tpu.concatenate %78, %77 in 1 : vector<128x12xf32>, vector<128x4xf32> -> vector<128x16xf32>
    %c7 = arith.constant 7 : index
    %c0_52 = arith.constant 0 : index
    %c0_53 = arith.constant 0 : index
    %80 = vector.load %arg2[%c7, %c0_52, %c0_53] : memref<9x1x16xf32, #tpu.memory_space<vmem>>, vector<1x1x16xf32>
    %81 = vector.shape_cast %80 : vector<1x1x16xf32> to vector<1x16xf32>
    %82 = vector.broadcast %81 : vector<1x16xf32> to vector<128x16xf32>
    %83 = arith.mulf %79, %82 : vector<128x16xf32>
    %c7_54 = arith.constant 7 : index
    %c0_55 = arith.constant 0 : index
    %c0_56 = arith.constant 0 : index
    %84 = vector.load %arg1[%c7_54, %c0_55, %c0_56] : memref<9x64x128xf32, #tpu.memory_space<vmem>>, vector<1x64x128xf32>
    %85 = vector.shape_cast %84 : vector<1x64x128xf32> to vector<64x128xf32>
    %cst_57 = arith.constant dense<0.000000e+00> : vector<64x16xf32>
    %86 = tpu.matmul %85, %83, %cst_57 {dimension_numbers = #tpu.dot_dimension_numbers<[1], [0], [0], [1], [0, 0, 1, 1], [], []>} : vector<64x128xf32>, vector<128x16xf32>, vector<64x16xf32> -> vector<64x16xf32>
    %87 = arith.addf %76, %86 : vector<64x16xf32>
    %cst_58 = arith.constant 0.000000e+00 : f32
    %88 = vector.broadcast %cst_58 : f32 to vector<128x5xf32>
    %89 = vector.extract_strided_slice %1 {offsets = [0, 5], sizes = [128, 11], strides = [1, 1]} : vector<128x16xf32> to vector<128x11xf32>
    %90 = tpu.concatenate %89, %88 in 1 : vector<128x11xf32>, vector<128x5xf32> -> vector<128x16xf32>
    %c8 = arith.constant 8 : index
    %c0_59 = arith.constant 0 : index
    %c0_60 = arith.constant 0 : index
    %91 = vector.load %arg2[%c8, %c0_59, %c0_60] : memref<9x1x16xf32, #tpu.memory_space<vmem>>, vector<1x1x16xf32>
    %92 = vector.shape_cast %91 : vector<1x1x16xf32> to vector<1x16xf32>
    %93 = vector.broadcast %92 : vector<1x16xf32> to vector<128x16xf32>
    %94 = arith.mulf %90, %93 : vector<128x16xf32>
    %c8_61 = arith.constant 8 : index
    %c0_62 = arith.constant 0 : index
    %c0_63 = arith.constant 0 : index
    %95 = vector.load %arg1[%c8_61, %c0_62, %c0_63] : memref<9x64x128xf32, #tpu.memory_space<vmem>>, vector<1x64x128xf32>
    %96 = vector.shape_cast %95 : vector<1x64x128xf32> to vector<64x128xf32>
    %cst_64 = arith.constant dense<0.000000e+00> : vector<64x16xf32>
    %97 = tpu.matmul %96, %94, %cst_64 {dimension_numbers = #tpu.dot_dimension_numbers<[1], [0], [0], [1], [0, 0, 1, 1], [], []>} : vector<64x128xf32>, vector<128x16xf32>, vector<64x16xf32> -> vector<64x16xf32>
    %98 = arith.addf %87, %97 : vector<64x16xf32>
    %c0_65 = arith.constant 0 : index
    %c0_66 = arith.constant 0 : index
    %c0_67 = arith.constant 0 : index
    %99 = vector.load %arg4[%c0_65, %c0_66, %c0_67] : memref<1x64x16xf32, #tpu.memory_space<vmem>>, vector<1x64x16xf32>
    %100 = vector.shape_cast %99 : vector<1x64x16xf32> to vector<64x16xf32>
    %101 = vector.shape_cast %98 : vector<64x16xf32> to vector<1x64x16xf32>
    tpu.vector_store %arg4[%c0_65, %c0_66, %c0_67], %101 {strides = array<i32>} : memref<1x64x16xf32, #tpu.memory_space<vmem>>, vector<1x64x16xf32>,
    return
  }
  func.func @transform_0(%arg0: i32) -> (i32, i32, i32) {
    %c0_i32 = arith.constant 0 : i32
    %c0_i32_0 = arith.constant 0 : i32
    %c0_i32_1 = arith.constant 0 : i32
    %c0_i32_2 = arith.constant 0 : i32
    return %c0_i32, %c0_i32_0, %c0_i32_1 : i32, i32, i32
  }
  func.func @transform_1(%arg0: i32) -> (i32, i32, i32) {
    %c0_i32 = arith.constant 0 : i32
    %c0_i32_0 = arith.constant 0 : i32
    %c0_i32_1 = arith.constant 0 : i32
    %c0_i32_2 = arith.constant 0 : i32
    return %c0_i32, %c0_i32_0, %c0_i32_1 : i32, i32, i32
  }
  func.func @transform_2(%arg0: i32) -> (i32, i32, i32) {
    %c0_i32 = arith.constant 0 : i32
    %c0_i32_0 = arith.constant 0 : i32
    %c0_i32_1 = arith.constant 0 : i32
    return %arg0, %c0_i32, %c0_i32_0 : i32, i32, i32
  }
  func.func @transform_3(%arg0: i32) -> (i32, i32, i32) {
    %c0_i32 = arith.constant 0 : i32
    %c0_i32_0 = arith.constant 0 : i32
    %c0_i32_1 = arith.constant 0 : i32
    return %arg0, %c0_i32, %c0_i32_0 : i32, i32, i32
  }
}

</mosaic_0001>

<bundles_post_ra>
// kernel: conv3x3.1
= control target key start
LH: loop header
LB: loop body
LE: loop exit
PB: predicated region body
PF: predicated region fallthrough
CT: control target
= control target key end

     0   :  { %8 = vsyncpa [#allocation3], 0  ;;  %s3234_s12 = smov 0   ;;  %s3923_s0 = inlined_call_operand.hbm [shape: f32[9,64,128], index: 0, kind: input, shape index: {}]   ;;  %s3924_s1 = inlined_call_operand.vmem [shape: f32[9,1,16], index: 1, kind: input, shape index: {}]   ;;  %s3925_s2 = inlined_call_operand.vmem [shape: f32[2,128,16], index: 2, kind: input, shape index: {}]   ;;  %s3926_s3 = inlined_call_operand.vmem [shape: f32[2,64,16], index: 3, kind: output, shape index: {}]  }
   0x1 LB: > { %s3240_s13 = sadd.s32 4294967295, %s3201_s12   ;;  %p2112_p0 = scmp.ge.s32.totalorder %s3201_s12, 1  ;;  %s3201_s12 = sphi %s3234_s12, %s14_s12  }
   0x2   : > { %p113_p1 = scmp.lt.s32.totalorder %s3201_s12, 3  ;;  %s3203_s14 = smov [#allocation2]  }
   0x3   : > { %s125_s15 = sshll.u32 %s3203_s14, 4  ;;  %p3927_p3 = scmp.eq.s32.totalorder %s3240_s13, 0  ;;  %s126_s15 = int_to_ptr.vmem [resolvable:$true] %s125_s15 }
   0x4   : > { %p3244_p2 = pnand %p2112_p0, %p113_p1  ;;  %s3163_s20 = scalar_lea.hbm %s3923_s0, 9216 }
   0x5   : > { %p3164_p6 = scmp.ne.s32.totalorder %s3923_s0, %s3163_s20  ;;  %p3170_p10 = scmp.lt.u32.totalorder %s3163_s20, %s3923_s0 }
   0x6   : > { %s3929_s16 = scalar_select %p3244_p2, 1, 0 }
   0x7   : > { %p3126_p4 = pneg %p3244_p2 }
   0x9   : > { %p3253_p5 = pnand %p3927_p3, %p3126_p4 }
   0xb   : > { %p3165_p7 = pneg %p3253_p5 }
   0xd   : > { %p3166_p8 = pnand %p3165_p7, %p3164_p6 }
   0xf   : > { %p3167_p9 = pneg %p3166_p8 }
  0x11   : > { %p3172_p11 = pnand %p3170_p10, %p3167_p9 }
  0x13   : > { %3175 = shalt.err (!%p3172_p11)
}
  0x14   : > { %s3176_s25 = scalar_lea.vmem %s126_s15, 9216  ;;  %p3184_p1 = scmp.lt.s32.totalorder %s126_s15, %s126_s15 }
  0x15   : > { %p3177_p12 = scmp.ne.s32.totalorder %s126_s15, %s3176_s25  ;;  %p3185_p4 = scmp.lt.s32.totalorder %s3176_s25, %s3176_s25 }
  0x17   : > { %p3179_p13 = pnand %p3177_p12, %p3165_p7  ;;  %p3186_p3 = por %p3185_p4, %p3184_p1 }
  0x19   : > { %p3180_p0 = pneg %p3179_p13 }
  0x1b   : > { %p3187_p2 = pnand %p3186_p3, %p3180_p0 }
  0x1d   : > { %3190 = shalt.err (!%p3187_p2)
}
  0x1e   : > { %s3204_s26 = smov 128   ;;  %s3205_s27 = smov 8  }
  0x1f   : > { %3129 = dma.hbm_to_vmem [thread:$0]  (!%p3253_p5), %s3923_s0, 9216, %s126_s15, [#allocation3], %s3204_s26, %s3204_s26, %s3205_s27  }
  0x20   : > { %p3931_p6 = scmp.ne.s32.totalorder %s3929_s16, 0 }
  0x21   : > { %p3932_p8 = scmp.eq.s32.totalorder (!%p3931_p6), %s3240_s13, 0 }
  0x22   : > { %152 = sbr.rel (%p3931_p6) target bundleno = 645 (0x285), region = 32 }
  0x29   : > { %3196 = dma.done.wait (%p3932_p8), [#allocation3], 9216   ;;  %p3933_p7 = pmov %p3932_p8 }
  0x2a   : > { %p176_p2 = scmp.lt.s32.totalorder %s3240_s13, 1  ;;  %s3206_s7 = smov 4   ;;  %v2129_v6 = vld [vmem:[%s3924_s1 + $0x4] ss:$0 sm:$0xff]  ;;  %v1070_v43 = vld [vmem:[#allocation2 + $0x108] sm:$0xff]  ;;  %v1071_v44 = vld [vmem:[#allocation2 + $0x110] sm:$0xff] }
  0x2b   : > { %3198 = vsyncadd (%p3933_p7), [#allocation3], 4294958080  ;;  %v404_v37 = vld [vmem:[#allocation2 + $0x40] sm:$0xff]  ;;  %s3207_s10 = smov 5   ;;  %s3208_s11 = smov 127   ;;  %v1072_v45 = vld [vmem:[#allocation2 + $0x118] sm:$0xff] }
  0x2c   : > { %s3935_s13 = smov (!%p176_p2, %s3240_s13), 1  ;;  %v1069_v38 = vld [vmem:[#allocation2 + $0x100] sm:$0xff]  ;;  %2390 = vmatprep.mubr.f32.mxu1 %v404_v37  ;;  %v1074_v47 = vld [vmem:[#allocation2 + $0x128] sm:$0xff]  ;;  %v1075_v48 = vld [vmem:[#allocation2 + $0x130] sm:$0xff]  ;;  %s3209_s14 = smov 3   ;;  %vm362_vm0 = vcmask 31744  }
  0x2d   : > { %s2140_s30 = sshll.u32 %s3935_s13, 7  ;;  %2566 = vmatprep.mubr.f32.mxu0 %v1069_v38  ;;  %v1073_v46 = vld [vmem:[#allocation2 + $0x120] sm:$0xff]  ;;  %v1076_v49 = vld [vmem:[#allocation2 + $0x138] sm:$0xff]  ;;  %s3210_s15 = smov 125   ;;  %vm266_vm1 = vcmask 39936   ;;  %vm1238_vm2 = vcmask 121856  }
  0x2e   : > { %s3287_s6 = scalar_lea.vmem %s3925_s2, %s2140_s30  ;;  %v1280_v50 = vld [vmem:[#allocation2 + $0x140] sm:$0xff]  ;;  %s3211_s22 = smov 1   ;;  %vm670_vm3 = vcmask 23552   ;;  %vm1449_vm4 = vcmask 105472   ;;  %vm881_vm5 = vcmask 7168   ;;  %vm1660_vm6 = vcmask 97280  }
  0x2f   : > { %v3290_v0 = vld [vmem:[%s3287_s6 + $0x10] sm:$0xff]  ;;  %v3293_v1 = vld [vmem:[%s3287_s6] sm:$0xff]  ;;  %v3300_v2 = vld [vmem:[%s3287_s6 + $0x18] sm:$0xff]  ;;  %s3212_s23 = smov 124   ;;  %s3213_s28 = smov 123   ;;  %vm1871_vm7 = vcmask 89088  }
  0x30   : > { %318 = vrot.lane.b32.xlu1 %v3290_v0, %s3206_s7  ;;  %314 = vrot.lane.b32.xlu0 %v3293_v1, %s3206_s7  ;;  %v3303_v3 = vld [vmem:[%s3287_s6 + $0x8] sm:$0xff]  ;;  %v3313_v5 = vld [vmem:[%s3287_s6 + $0x20] sm:$0xff]  ;;  %v1052_v7 = vmul.f32 %v2129_v6, %v3293_v1  ;;  %v1054_v9 = vmul.f32 %v2129_v6, %v3290_v0  ;;  %v1055_v10 = vmul.f32 %v2129_v6, %v3300_v2  ;;  %s2141_s8 = sshll.u32 %s3935_s13, 6  ;;  %vm2034_vm8 = vcmask 130048  }
  0x31   : > { %v3310_v4 = vld [vmem:[%s3287_s6 + $0x28] sm:$0xff]  ;;  %v1053_v8 = vmul.f32 %v2129_v6, %v3303_v3  ;;  %v3327_v12 = vld [vmem:[%s3287_s6 + $0x38] sm:$0xff]  ;;  %v3330_v13 = vld [vmem:[%s3287_s6 + $0x30] sm:$0xff]  ;;  %v1056_v15 = vmul.f32 %v2129_v6, %v3313_v5 }
  0x32   : > { %v2886_v14 = vpack.c.bf16 %v1055_v10, %v1054_v9  ;;  %v1057_v16 = vmul.f32 %v2129_v6, %v3310_v4  ;;  %v3339_v17 = vld [vmem:[%s3287_s6 + $0x48] sm:$0xff]  ;;  %v3342_v18 = vld [vmem:[%s3287_s6 + $0x40] sm:$0xff]  ;;  %v1058_v20 = vmul.f32 %v2129_v6, %v3330_v13  ;;  %v1059_v21 = vmul.f32 %v2129_v6, %v3327_v12  ;;  %v3351_v22 = vld [vmem:[%s3287_s6 + $0x58] sm:$0xff] }
  0x33   : > { %v2882_v11 = vpack.c.bf16 %v1053_v8, %v1052_v7  ;;  %v3354_v23 = vld [vmem:[%s3287_s6 + $0x50] sm:$0xff]  ;;  %v1060_v25 = vmul.f32 %v2129_v6, %v3342_v18  ;;  %v1061_v26 = vmul.f32 %v2129_v6, %v3339_v17  ;;  %v3363_v27 = vld [vmem:[%s3287_s6 + $0x68] sm:$0xff]  ;;  %v3366_v28 = vld [vmem:[%s3287_s6 + $0x60] sm:$0xff]  ;;  %v1063_v31 = vmul.f32 %v2129_v6, %v3351_v22 }
  0x34   : > { %320 = vrot.lane.b32.xlu1 %v3300_v2, %s3206_s7  ;;  %316 = vrot.lane.b32.xlu0 %v3303_v3, %s3206_s7  ;;  %v2890_v19 = vpack.c.bf16 %v1057_v16, %v1056_v15  ;;  %v2894_v24 = vpack.c.bf16 %v1059_v21, %v1058_v20  ;;  %v1062_v30 = vmul.f32 %v2129_v6, %v3354_v23  ;;  %v3375_v32 = vld [vmem:[%s3287_s6 + $0x78] sm:$0xff]  ;;  %v3378_v33 = vld [vmem:[%s3287_s6 + $0x70] sm:$0xff] }
  0x35   : > { %2883 = vmatprep.subr.bf16.mxu0 %v2882_v11  ;;  %v2898_v29 = vpack.c.bf16 %v1061_v26, %v1060_v25  ;;  %v1064_v35 = vmul.f32 %v2129_v6, %v3366_v28  ;;  %v1065_v36 = vmul.f32 %v2129_v6, %v3363_v27  ;;  %v1066_v40 = vmul.f32 %v2129_v6, %v3378_v33  ;;  %v3479_v53 = vld [vmem:[%s3924_s1 + $0x1] ss:$0 sm:$0xff] }
  0x36   : > { %2885 = vmatpush3.bf16.msra.mxu0 %v2882_v11  ;;  %v2902_v34 = vpack.c.bf16 %v1063_v31, %v1062_v30  ;;  %v1067_v41 = vmul.f32 %v2129_v6, %v3375_v32 }
  0x37   : > { %2887 = vmatprep.subr.bf16.mxu0 %v2886_v14  ;;  %v2906_v39 = vpack.c.bf16 %v1065_v36, %v1064_v35 }
  0x38   : > { %324 = vrot.lane.b32.xlu1 %v3310_v4, %s3206_s7  ;;  %322 = vrot.lane.b32.xlu0 %v3313_v5, %s3206_s7  ;;  %v2910_v42 = vpack.c.bf16 %v1067_v41, %v1066_v40 }
  0x3a   : > { %2889 = vmatpush3.bf16.msra.mxu0 %v2886_v14 }
  0x3b   : > { %2891 = vmatprep.subr.bf16.mxu0 %v2890_v19 }
  0x3c   : > { %328 = vrot.lane.b32.xlu1 %v3327_v12, %s3206_s7  ;;  %326 = vrot.lane.b32.xlu0 %v3330_v13, %s3206_s7 }
  0x3e   : > { %2893 = vmatpush3.bf16.msra.mxu0 %v2890_v19 }
  0x3f   : > { %2895 = vmatprep.subr.bf16.mxu0 %v2894_v24 }
  0x40   : > { %332 = vrot.lane.b32.xlu1 %v3339_v17, %s3206_s7  ;;  %330 = vrot.lane.b32.xlu0 %v3342_v18, %s3206_s7 }
  0x42   : > { %2897 = vmatpush3.bf16.msra.mxu0 %v2894_v24 }
  0x43   : > { %2899 = vmatprep.subr.bf16.mxu0 %v2898_v29 }
  0x44   : > { %336 = vrot.lane.b32.xlu1 %v3351_v22, %s3206_s7  ;;  %334 = vrot.lane.b32.xlu0 %v3354_v23, %s3206_s7 }
  0x46   : > { %2901 = vmatpush3.bf16.msra.mxu0 %v2898_v29 }
  0x47   : > { %2903 = vmatprep.subr.bf16.mxu0 %v2902_v34 }
  0x48   : > { %340 = vrot.lane.b32.xlu1 %v3363_v27, %s3206_s7  ;;  %338 = vrot.lane.b32.xlu0 %v3366_v28, %s3206_s7 }
  0x4a   : > { %2905 = vmatpush3.bf16.msra.mxu0 %v2902_v34 }
  0x4b   : > { %2907 = vmatprep.subr.bf16.mxu0 %v2906_v39 }
  0x4c   : > { %344 = vrot.lane.b32.xlu1 %v3375_v32, %s3206_s7  ;;  %342 = vrot.lane.b32.xlu0 %v3378_v33, %s3206_s7 }
  0x4e   : > { %2909 = vmatpush3.bf16.msra.mxu0 %v2906_v39 }
  0x4f   : > { %2911 = vmatprep.subr.bf16.mxu0 %v2910_v42 }
  0x50   : > { %220 = vrot.lane.b32.xlu1 %v3303_v3, %s3207_s10  ;;  %218 = vrot.lane.b32.xlu0 %v3293_v1, %s3207_s10 }
  0x52   : > { %2913 = vmatpush3.bf16.msra.mxu0 %v2910_v42 }
  0x54   : > { %1192 = vrot.lane.b32.xlu1 %v3303_v3, %s3208_s11  ;;  %1190 = vrot.lane.b32.xlu0 %v3293_v1, %s3208_s11 }
  0x55   : > { %2567 = vmatmul.mubr.f32.vlgmr.msra.gmra.mrb[0].mxu0 %v1070_v43 }
  0x56   : > { %2569 = vmatprep.mubr.f32.mxu0 %v1071_v44 }
  0x58   : > { %224 = vrot.lane.b32.xlu1 %v3300_v2, %s3207_s10  ;;  %222 = vrot.lane.b32.xlu0 %v3290_v0, %s3207_s10 }
  0x59   : > { %2570 = vmatmul.mubr.f32.gmra.mrb[2].mxu0 %v1072_v45 }
  0x5a   : > { %2572 = vmatprep.mubr.f32.mxu0 %v1073_v46 }
  0x5c   : > { %1196 = vrot.lane.b32.xlu1 %v3300_v2, %s3208_s11  ;;  %1194 = vrot.lane.b32.xlu0 %v3290_v0, %s3208_s11 }
  0x5d   : > { %2573 = vmatmul.mubr.f32.gmra.mrb[4].mxu0 %v1074_v47 }
  0x5e   : > { %2575 = vmatprep.mubr.f32.mxu0 %v1075_v48 }
  0x60   : > { %228 = vrot.lane.b32.xlu1 %v3310_v4, %s3207_s10  ;;  %226 = vrot.lane.b32.xlu0 %v3313_v5, %s3207_s10 }
  0x61   : > { %2576 = vmatmul.mubr.f32.gmra.mrb[6].mxu0 %v1076_v49 }
  0x62   : > { %2610 = vmatprep.mubr.f32.mxu0 %v1280_v50 }
  0x64   : > { %1200 = vrot.lane.b32.xlu1 %v3310_v4, %s3208_s11  ;;  %1198 = vrot.lane.b32.xlu0 %v3313_v5, %s3208_s11 }
  0x68   : > { %232 = vrot.lane.b32.xlu1 %v3327_v12, %s3207_s10  ;;  %230 = vrot.lane.b32.xlu0 %v3330_v13, %s3207_s10 }
  0x6c   : > { %1204 = vrot.lane.b32.xlu1 %v3327_v12, %s3208_s11  ;;  %1202 = vrot.lane.b32.xlu0 %v3330_v13, %s3208_s11 }
  0x70   : > { %236 = vrot.lane.b32.xlu1 %v3339_v17, %s3207_s10  ;;  %234 = vrot.lane.b32.xlu0 %v3342_v18, %s3207_s10 }
  0x74   : > { %1208 = vrot.lane.b32.xlu1 %v3339_v17, %s3208_s11  ;;  %1206 = vrot.lane.b32.xlu0 %v3342_v18, %s3208_s11 }
  0x78   : > { %240 = vrot.lane.b32.xlu1 %v3351_v22, %s3207_s10  ;;  %238 = vrot.lane.b32.xlu0 %v3354_v23, %s3207_s10 }
  0x7c   : > { %1212 = vrot.lane.b32.xlu1 %v3351_v22, %s3208_s11  ;;  %1210 = vrot.lane.b32.xlu0 %v3354_v23, %s3208_s11 }
  0x80   : > { %244 = vrot.lane.b32.xlu1 %v3363_v27, %s3207_s10  ;;  %242 = vrot.lane.b32.xlu0 %v3366_v28, %s3207_s10 }
  0x84   : > { %1216 = vrot.lane.b32.xlu1 %v3363_v27, %s3208_s11  ;;  %1214 = vrot.lane.b32.xlu0 %v3366_v28, %s3208_s11 }
  0x88   : > { %248 = vrot.lane.b32.xlu1 %v3375_v32, %s3207_s10  ;;  %246 = vrot.lane.b32.xlu0 %v3378_v33, %s3207_s10 }
  0x8c   : > { %1220 = vrot.lane.b32.xlu1 %v3375_v32, %s3208_s11  ;;  %1218 = vrot.lane.b32.xlu0 %v3378_v33, %s3208_s11  ;;  %s185_s11 = scalar_lea.vmem %s3926_s3, %s2141_s8 }
  0x90   : > { %624 = vrot.lane.b32.xlu1 %v3303_v3, %s3209_s14  ;;  %622 = vrot.lane.b32.xlu0 %v3293_v1, %s3209_s14 }
  0x94   : > { %1403 = vrot.lane.b32.xlu1 %v3303_v3, %s3210_s15  ;;  %1401 = vrot.lane.b32.xlu0 %v3293_v1, %s3210_s15 }
  0x98   : > { %628 = vrot.lane.b32.xlu1 %v3300_v2, %s3209_s14  ;;  %626 = vrot.lane.b32.xlu0 %v3290_v0, %s3209_s14 }
  0x9c   : > { %1407 = vrot.lane.b32.xlu1 %v3300_v2, %s3210_s15  ;;  %1405 = vrot.lane.b32.xlu0 %v3290_v0, %s3210_s15 }
  0xa0   : > { %632 = vrot.lane.b32.xlu1 %v3310_v4, %s3209_s14  ;;  %630 = vrot.lane.b32.xlu0 %v3313_v5, %s3209_s14 }
  0xa2   : > { %v319_v51 = vpop.permute.xlu1 %318  ;;  %v315_v52 = vpop.permute.xlu0 %314 }
  0xa3   : > { %v363_v54 = vsel %vm362_vm0, 0.0, %v315_v52  ;;  %v365_v59 = vsel %vm362_vm0, 0.0, %v319_v51 }
  0xa4   : > { %1411 = vrot.lane.b32.xlu1 %v3310_v4, %s3210_s15  ;;  %1409 = vrot.lane.b32.xlu0 %v3313_v5, %s3210_s15  ;;  %v387_v60 = vmul.f32 %v3479_v53, %v363_v54  ;;  %v389_v8 = vmul.f32 %v3479_v53, %v365_v59 }
  0xa6   : > { %v321_v55 = vpop.permute.xlu1 %320  ;;  %v317_v56 = vpop.permute.xlu0 %316 }
  0xa7   : > { %v366_v57 = vsel %vm362_vm0, 0.0, %v321_v55  ;;  %v364_v58 = vsel %vm362_vm0, 0.0, %v317_v56 }
  0xa8   : > { %v388_v61 = vmul.f32 %v3479_v53, %v364_v58  ;;  %636 = vrot.lane.b32.xlu1 %v3327_v12, %s3209_s14  ;;  %634 = vrot.lane.b32.xlu0 %v3330_v13, %s3209_s14  ;;  %v390_v62 = vmul.f32 %v3479_v53, %v366_v57 }
  0xaa   : > { %v325_v63 = vpop.permute.xlu1 %324  ;;  %v323_v6 = vpop.permute.xlu0 %322  ;;  %v2754_v7 = vpack.c.bf16 %v388_v61, %v387_v60  ;;  %v2758_v15 = vpack.c.bf16 %v390_v62, %v389_v8  ;;  %v3544_v60 = vld [vmem:[%s3924_s1] ss:$0 sm:$0xff]  ;;  %v3557_v8 = vld [vmem:[%s3924_s1 + $0x5] ss:$0 sm:$0xff] }
  0xab   : > { %v368_v9 = vsel %vm362_vm0, 0.0, %v325_v63  ;;  %v367_v10 = vsel %vm362_vm0, 0.0, %v323_v6 }
  0xac   : > { %1415 = vrot.lane.b32.xlu1 %v3327_v12, %s3210_s15  ;;  %1413 = vrot.lane.b32.xlu0 %v3330_v13, %s3210_s15  ;;  %v392_v11 = vmul.f32 %v3479_v53, %v368_v9  ;;  %v391_v14 = vmul.f32 %v3479_v53, %v367_v10 }
  0xad   : > { %2755 = vmatprep.subr.bf16.mxu1 %v2754_v7 }
  0xae   : > { %2757 = vmatpush3.bf16.msra.mxu1 %v2754_v7  ;;  %v329_v16 = vpop.permute.xlu1 %328  ;;  %v327_v19 = vpop.permute.xlu0 %326  ;;  %v2762_v26 = vpack.c.bf16 %v392_v11, %v391_v14 }
  0xaf   : > { %v370_v20 = vsel %vm362_vm0, 0.0, %v329_v16  ;;  %2759 = vmatprep.subr.bf16.mxu1 %v2758_v15  ;;  %v369_v21 = vsel %vm362_vm0, 0.0, %v327_v19 }
  0xb0   : > { %640 = vrot.lane.b32.xlu1 %v3339_v17, %s3209_s14  ;;  %638 = vrot.lane.b32.xlu0 %v3342_v18, %s3209_s14  ;;  %v394_v24 = vmul.f32 %v3479_v53, %v370_v20  ;;  %v393_v25 = vmul.f32 %v3479_v53, %v369_v21 }
  0xb2   : > { %2761 = vmatpush3.bf16.msra.mxu1 %v2758_v15  ;;  %v333_v29 = vpop.permute.xlu1 %332  ;;  %v331_v30 = vpop.permute.xlu0 %330  ;;  %v2766_v37 = vpack.c.bf16 %v394_v24, %v393_v25 }
  0xb3   : > { %v372_v31 = vsel %vm362_vm0, 0.0, %v333_v29  ;;  %2763 = vmatprep.subr.bf16.mxu1 %v2762_v26  ;;  %v371_v34 = vsel %vm362_vm0, 0.0, %v331_v30 }
  0xb4   : > { %1419 = vrot.lane.b32.xlu1 %v3339_v17, %s3210_s15  ;;  %1417 = vrot.lane.b32.xlu0 %v3342_v18, %s3210_s15  ;;  %v396_v35 = vmul.f32 %v3479_v53, %v372_v31  ;;  %v395_v36 = vmul.f32 %v3479_v53, %v371_v34 }
  0xb6   : > { %2765 = vmatpush3.bf16.msra.mxu1 %v2762_v26  ;;  %v337_v38 = vpop.permute.xlu1 %336  ;;  %v335_v39 = vpop.permute.xlu0 %334  ;;  %v2770_v44 = vpack.c.bf16 %v396_v35, %v395_v36  ;;  %v405_v26 = vld [vmem:[#allocation2 + $0x48] sm:$0xff]  ;;  %v406_v35 = vld [vmem:[#allocation2 + $0x50] sm:$0xff] }
  0xb7   : > { %v374_v40 = vsel %vm362_vm0, 0.0, %v337_v38  ;;  %2767 = vmatprep.subr.bf16.mxu1 %v2766_v37  ;;  %v373_v41 = vsel %vm362_vm0, 0.0, %v335_v39  ;;  %v407_v39 = vld [vmem:[#allocation2 + $0x58] sm:$0xff] }
  0xb8   : > { %644 = vrot.lane.b32.xlu1 %v3351_v22, %s3209_s14  ;;  %642 = vrot.lane.b32.xlu0 %v3354_v23, %s3209_s14  ;;  %v398_v42 = vmul.f32 %v3479_v53, %v374_v40  ;;  %v397_v43 = vmul.f32 %v3479_v53, %v373_v41 }
  0xba   : > { %2769 = vmatpush3.bf16.msra.mxu1 %v2766_v37  ;;  %v341_v45 = vpop.permute.xlu1 %340  ;;  %v339_v46 = vpop.permute.xlu0 %338  ;;  %v2774_v51 = vpack.c.bf16 %v398_v42, %v397_v43  ;;  %v408_v42 = vld [vmem:[#allocation2 + $0x60] sm:$0xff] }
  0xbb   : > { %v376_v47 = vsel %vm362_vm0, 0.0, %v341_v45  ;;  %2771 = vmatprep.subr.bf16.mxu1 %v2770_v44  ;;  %v375_v48 = vsel %vm362_vm0, 0.0, %v339_v46 }
  0xbc   : > { %1423 = vrot.lane.b32.xlu1 %v3351_v22, %s3210_s15  ;;  %1421 = vrot.lane.b32.xlu0 %v3354_v23, %s3210_s15  ;;  %v400_v49 = vmul.f32 %v3479_v53, %v376_v47  ;;  %v399_v50 = vmul.f32 %v3479_v53, %v375_v48  ;;  %v409_v48 = vld [vmem:[#allocation2 + $0x68] sm:$0xff] }
  0xbe   : > { %2773 = vmatpush3.bf16.msra.mxu1 %v2770_v44  ;;  %v345_v52 = vpop.permute.xlu1 %344  ;;  %v343_v54 = vpop.permute.xlu0 %342  ;;  %v2778_v59 = vpack.c.bf16 %v400_v49, %v399_v50 }
  0xbf   : > { %v378_v55 = vsel %vm362_vm0, 0.0, %v345_v52  ;;  %2775 = vmatprep.subr.bf16.mxu1 %v2774_v51  ;;  %v377_v56 = vsel %vm362_vm0, 0.0, %v343_v54 }
  0xc0   : > { %648 = vrot.lane.b32.xlu1 %v3363_v27, %s3209_s14  ;;  %646 = vrot.lane.b32.xlu0 %v3366_v28, %s3209_s14  ;;  %v402_v57 = vmul.f32 %v3479_v53, %v378_v55  ;;  %v401_v58 = vmul.f32 %v3479_v53, %v377_v56 }
  0xc2   : > { %2777 = vmatpush3.bf16.msra.mxu1 %v2774_v51  ;;  %v221_v61 = vpop.permute.xlu1 %220  ;;  %v219_v62 = vpop.permute.xlu0 %218  ;;  %v2782_v9 = vpack.c.bf16 %v402_v57, %v401_v58  ;;  %v410_v51 = vld [vmem:[#allocation2 + $0x70] sm:$0xff]  ;;  %v411_v58 = vld [vmem:[#allocation2 + $0x78] sm:$0xff] }
  0xc3   : > { %v268_v63 = vsel %vm266_vm1, 0.0, %v221_v61  ;;  %2779 = vmatprep.subr.bf16.mxu1 %v2778_v59  ;;  %v267_v6 = vsel %vm266_vm1, 0.0, %v219_v62  ;;  %v306_v62 = vld [vmem:[#allocation2] sm:$0xff] }
  0xc4   : > { %1427 = vrot.lane.b32.xlu1 %v3363_v27, %s3210_s15  ;;  %1425 = vrot.lane.b32.xlu0 %v3366_v28, %s3210_s15  ;;  %v291_v53 = vmul.f32 %v3544_v60, %v268_v63  ;;  %v290_v7 = vmul.f32 %v3544_v60, %v267_v6 }
  0xc6   : > { %2781 = vmatpush3.bf16.msra.mxu1 %v2778_v59  ;;  %v1193_v10 = vpop.permute.xlu1 %1192  ;;  %v1191_v11 = vpop.permute.xlu0 %1190  ;;  %v2786_v20 = vpack.c.bf16 %v291_v53, %v290_v7 }
  0xc7   : > { %v1240_v14 = vsel %vm1238_vm2, %v1193_v10, 0.0  ;;  %2783 = vmatprep.subr.bf16.mxu1 %v2782_v9  ;;  %v1239_v15 = vsel %vm1238_vm2, %v1191_v11, 0.0 }
  0xc8   : > { %v1264_v16 = vmul.f32 %v3557_v8, %v1240_v14  ;;  %v1263_v19 = vmul.f32 %v3557_v8, %v1239_v15  ;;  %652 = vrot.lane.b32.xlu1 %v3375_v32, %s3209_s14  ;;  %650 = vrot.lane.b32.xlu0 %v3378_v33, %s3209_s14 }
  0xca   : > { %2785 = vmatpush3.bf16.msra.mxu1 %v2782_v9  ;;  %v225_v21 = vpop.permute.xlu1 %224  ;;  %v223_v24 = vpop.permute.xlu0 %222  ;;  %v2914_v25 = vpack.c.bf16 %v1264_v16, %v1263_v19 }
  0xcb   : > { %v270_v29 = vsel %vm266_vm1, 0.0, %v225_v21  ;;  %2787 = vmatprep.subr.bf16.mxu1 %v2786_v20  ;;  %v269_v30 = vsel %vm266_vm1, 0.0, %v223_v24 }
  0xcc   : > { %v293_v31 = vmul.f32 %v3544_v60, %v270_v29  ;;  %v292_v34 = vmul.f32 %v3544_v60, %v269_v30  ;;  %1431 = vrot.lane.b32.xlu1 %v3375_v32, %s3210_s15  ;;  %1429 = vrot.lane.b32.xlu0 %v3378_v33, %s3210_s15 }
  0xcd   : > { %2915 = vmatprep.subr.bf16.mxu0 %v2914_v25  ;;  %2391 = vmatmul.mubr.f32.vlgmr.msra.gmra.mrb[0].mxu1 %v405_v26 }
  0xce   : > { %2789 = vmatpush3.bf16.msra.mxu1 %v2786_v20  ;;  %2917 = vmatpush3.bf16.msra.mxu0 %v2914_v25  ;;  %v1197_v36 = vpop.permute.xlu1 %1196  ;;  %v1195_v37 = vpop.permute.xlu0 %1194  ;;  %v2790_v38 = vpack.c.bf16 %v293_v31, %v292_v34 }
  0xcf   : > { %v1242_v40 = vsel %vm1238_vm2, %v1197_v36, 0.0  ;;  %v1241_v41 = vsel %vm1238_vm2, %v1195_v37, 0.0  ;;  %2393 = vmatprep.mubr.f32.mxu1 %v406_v35 }
  0xd0   : > { %v1266_v43 = vmul.f32 %v3557_v8, %v1242_v40  ;;  %v1265_v44 = vmul.f32 %v3557_v8, %v1241_v41  ;;  %835 = vrot.lane.b32.xlu1 %v3303_v3, %s3211_s22  ;;  %833 = vrot.lane.b32.xlu0 %v3293_v1, %s3211_s22 }
  0xd1   : > { %2791 = vmatprep.subr.bf16.mxu1 %v2790_v38  ;;  %2394 = vmatmul.mubr.f32.gmra.mrb[2].mxu1 %v407_v39 }
  0xd2   : > { %2793 = vmatpush3.bf16.msra.mxu1 %v2790_v38  ;;  %v229_v45 = vpop.permute.xlu1 %228  ;;  %v227_v46 = vpop.permute.xlu0 %226  ;;  %v2918_v47 = vpack.c.bf16 %v1266_v43, %v1265_v44  ;;  %2396 = vmatprep.mubr.f32.mxu1 %v408_v42 }
  0xd3   : > { %v272_v49 = vsel %vm266_vm1, 0.0, %v229_v45  ;;  %v271_v50 = vsel %vm266_vm1, 0.0, %v227_v46 }
  0xd4   : > { %v295_v52 = vmul.f32 %v3544_v60, %v272_v49  ;;  %v294_v54 = vmul.f32 %v3544_v60, %v271_v50  ;;  %1614 = vrot.lane.b32.xlu1 %v3303_v3, %s3212_s23  ;;  %1612 = vrot.lane.b32.xlu0 %v3293_v1, %s3212_s23 }
  0xd5   : > { %2919 = vmatprep.subr.bf16.mxu0 %v2918_v47  ;;  %2397 = vmatmul.mubr.f32.gmra.mrb[4].mxu1 %v409_v48 }
  0xd6   : > { %2921 = vmatpush3.bf16.msra.mxu0 %v2918_v47  ;;  %v1201_v55 = vpop.permute.xlu1 %1200  ;;  %v1199_v56 = vpop.permute.xlu0 %1198  ;;  %v2794_v57 = vpack.c.bf16 %v295_v52, %v294_v54  ;;  %2399 = vmatprep.mubr.f32.mxu1 %v410_v51 }
  0xd7   : > { %v1244_v59 = vsel %vm1238_vm2, %v1201_v55, 0.0  ;;  %v1243_v61 = vsel %vm1238_vm2, %v1199_v56, 0.0 }
  0xd8   : > { %v1268_v63 = vmul.f32 %v3557_v8, %v1244_v59  ;;  %v1267_v6 = vmul.f32 %v3557_v8, %v1243_v61  ;;  %839 = vrot.lane.b32.xlu1 %v3300_v2, %s3211_s22  ;;  %837 = vrot.lane.b32.xlu0 %v3290_v0, %s3211_s22 }
  0xd9   : > { %2795 = vmatprep.subr.bf16.mxu1 %v2794_v57  ;;  %2400 = vmatmul.mubr.f32.gmra.mrb[6].mxu1 %v411_v58 }
  0xda   : > { %2797 = vmatpush3.bf16.msra.mxu1 %v2794_v57  ;;  %v233_v53 = vpop.permute.xlu1 %232  ;;  %v231_v7 = vpop.permute.xlu0 %230  ;;  %v2922_v9 = vpack.c.bf16 %v1268_v63, %v1267_v6  ;;  %2434 = vmatprep.mubr.f32.mxu1 %v306_v62 }
  0xdb   : > { %v274_v10 = vsel %vm266_vm1, 0.0, %v233_v53  ;;  %v273_v11 = vsel %vm266_vm1, 0.0, %v231_v7 }
  0xdc   : > { %v297_v14 = vmul.f32 %v3544_v60, %v274_v10  ;;  %v296_v15 = vmul.f32 %v3544_v60, %v273_v11  ;;  %1618 = vrot.lane.b32.xlu1 %v3300_v2, %s3212_s23  ;;  %1616 = vrot.lane.b32.xlu0 %v3290_v0, %s3212_s23 }
  0xdd   : > { %2923 = vmatprep.subr.bf16.mxu0 %v2922_v9 }
  0xde   : > { %2925 = vmatpush3.bf16.msra.mxu0 %v2922_v9  ;;  %v1205_v16 = vpop.permute.xlu1 %1204  ;;  %v1203_v19 = vpop.permute.xlu0 %1202  ;;  %v2798_v20 = vpack.c.bf16 %v297_v14, %v296_v15 }
  0xdf   : > { %v1246_v21 = vsel %vm1238_vm2, %v1205_v16, 0.0  ;;  %v1245_v24 = vsel %vm1238_vm2, %v1203_v19, 0.0 }
  0xe0   : > { %v1270_v25 = vmul.f32 %v3557_v8, %v1246_v21  ;;  %v1269_v26 = vmul.f32 %v3557_v8, %v1245_v24  ;;  %843 = vrot.lane.b32.xlu1 %v3310_v4, %s3211_s22  ;;  %841 = vrot.lane.b32.xlu0 %v3313_v5, %s3211_s22 }
  0xe1   : > { %2799 = vmatprep.subr.bf16.mxu1 %v2798_v20 }
  0xe2   : > { %v2926_v29 = vpack.c.bf16 %v1270_v25, %v1269_v26  ;;  %2801 = vmatpush3.bf16.msra.mxu1 %v2798_v20  ;;  %v237_v30 = vpop.permute.xlu1 %236  ;;  %v235_v31 = vpop.permute.xlu0 %234 }
  0xe3   : > { %v276_v34 = vsel %vm266_vm1, 0.0, %v237_v30  ;;  %v275_v35 = vsel %vm266_vm1, 0.0, %v235_v31 }
  0xe4   : > { %v299_v36 = vmul.f32 %v3544_v60, %v276_v34  ;;  %v298_v37 = vmul.f32 %v3544_v60, %v275_v35  ;;  %1622 = vrot.lane.b32.xlu1 %v3310_v4, %s3212_s23  ;;  %1620 = vrot.lane.b32.xlu0 %v3313_v5, %s3212_s23 }
  0xe5   : > { %2927 = vmatprep.subr.bf16.mxu0 %v2926_v29 }
  0xe6   : > { %v2802_v38 = vpack.c.bf16 %v299_v36, %v298_v37  ;;  %2929 = vmatpush3.bf16.msra.mxu0 %v2926_v29  ;;  %v1209_v39 = vpop.permute.xlu1 %1208  ;;  %v1207_v40 = vpop.permute.xlu0 %1206  ;;  %v307_v36 = vld [vmem:[#allocation2 + $0x8] sm:$0xff] }
  0xe7   : > { %v1248_v41 = vsel %vm1238_vm2, %v1209_v39, 0.0  ;;  %v1247_v42 = vsel %vm1238_vm2, %v1207_v40, 0.0 }
  0xe8   : > { %v1272_v43 = vmul.f32 %v3557_v8, %v1248_v41  ;;  %v1271_v44 = vmul.f32 %v3557_v8, %v1247_v42  ;;  %847 = vrot.lane.b32.xlu1 %v3327_v12, %s3211_s22  ;;  %845 = vrot.lane.b32.xlu0 %v3330_v13, %s3211_s22  ;;  %v3695_v41 = vld [vmem:[%s3924_s1 + $0x6] ss:$0 sm:$0xff] }
  0xe9   : > { %2803 = vmatprep.subr.bf16.mxu1 %v2802_v38 }
  0xea   : > { %v2930_v4 = vpack.c.bf16 %v1272_v43, %v1271_v44  ;;  %2805 = vmatpush3.bf16.msra.mxu1 %v2802_v38  ;;  %v241_v5 = vpop.permute.xlu1 %240  ;;  %v239_v45 = vpop.permute.xlu0 %238  ;;  %v308_v38 = vld [vmem:[#allocation2 + $0x10] sm:$0xff] }
  0xeb   : > { %v278_v46 = vsel %vm266_vm1, 0.0, %v241_v5  ;;  %v277_v47 = vsel %vm266_vm1, 0.0, %v239_v45  ;;  %v1282_v45 = vld [vmem:[#allocation2 + $0x150] sm:$0xff] }
  0xec   : > { %v301_v48 = vmul.f32 %v3544_v60, %v278_v46  ;;  %v300_v49 = vmul.f32 %v3544_v60, %v277_v47  ;;  %1626 = vrot.lane.b32.xlu1 %v3327_v12, %s3212_s23  ;;  %1624 = vrot.lane.b32.xlu0 %v3330_v13, %s3212_s23  ;;  %v309_v47 = vld [vmem:[#allocation2 + $0x18] sm:$0xff] }
  0xed   : > { %2931 = vmatprep.subr.bf16.mxu0 %v2930_v4 }
  0xee   : > { %v2806_v50 = vpack.c.bf16 %v301_v48, %v300_v49  ;;  %2933 = vmatpush3.bf16.msra.mxu0 %v2930_v4  ;;  %v1213_v51 = vpop.permute.xlu1 %1212  ;;  %v1211_v52 = vpop.permute.xlu0 %1210  ;;  %v1281_v4 = vld [vmem:[#allocation2 + $0x148] sm:$0xff] }
  0xef   : > { %v1250_v54 = vsel %vm1238_vm2, %v1213_v51, 0.0  ;;  %v1249_v55 = vsel %vm1238_vm2, %v1211_v52, 0.0  ;;  %v310_v51 = vld [vmem:[#allocation2 + $0x20] sm:$0xff] }
  0xf0   : > { %v1274_v56 = vmul.f32 %v3557_v8, %v1250_v54  ;;  %v1273_v57 = vmul.f32 %v3557_v8, %v1249_v55  ;;  %851 = vrot.lane.b32.xlu1 %v3339_v17, %s3211_s22  ;;  %849 = vrot.lane.b32.xlu0 %v3342_v18, %s3211_s22 }
  0xf1   : > { %2807 = vmatprep.subr.bf16.mxu1 %v2806_v50 }
  0xf2   : > { %v2934_v12 = vpack.c.bf16 %v1274_v56, %v1273_v57  ;;  %2809 = vmatpush3.bf16.msra.mxu1 %v2806_v50  ;;  %v245_v13 = vpop.permute.xlu1 %244  ;;  %v243_v58 = vpop.permute.xlu0 %242  ;;  %v311_v57 = vld [vmem:[#allocation2 + $0x28] sm:$0xff] }
  0xf3   : > { %v280_v59 = vsel %vm266_vm1, 0.0, %v245_v13  ;;  %v279_v61 = vsel %vm266_vm1, 0.0, %v243_v58 }
  0xf4   : > { %v303_v62 = vmul.f32 %v3544_v60, %v280_v59  ;;  %v302_v63 = vmul.f32 %v3544_v60, %v279_v61  ;;  %1630 = vrot.lane.b32.xlu1 %v3339_v17, %s3212_s23  ;;  %1628 = vrot.lane.b32.xlu0 %v3342_v18, %s3212_s23  ;;  %v312_v61 = vld [vmem:[#allocation2 + $0x30] sm:$0xff] }
  0xf5   : > { %2935 = vmatprep.subr.bf16.mxu0 %v2934_v12 }
  0xf6   : > { %v2810_v6 = vpack.c.bf16 %v303_v62, %v302_v63  ;;  %2937 = vmatpush3.bf16.msra.mxu0 %v2934_v12  ;;  %v1217_v53 = vpop.permute.xlu1 %1216  ;;  %v1215_v7 = vpop.permute.xlu0 %1214  ;;  %v1283_v12 = vld [vmem:[#allocation2 + $0x158] sm:$0xff] }
  0xf7   : > { %v1252_v9 = vsel %vm1238_vm2, %v1217_v53, 0.0  ;;  %v1251_v10 = vsel %vm1238_vm2, %v1215_v7, 0.0  ;;  %v313_v53 = vld [vmem:[#allocation2 + $0x38] sm:$0xff]  ;;  %v1285_v7 = vld [vmem:[#allocation2 + $0x168] sm:$0xff] }
  0xf8   : > { %v1276_v11 = vmul.f32 %v3557_v8, %v1252_v9  ;;  %v1275_v14 = vmul.f32 %v3557_v8, %v1251_v10  ;;  %855 = vrot.lane.b32.xlu1 %v3351_v22, %s3211_s22  ;;  %853 = vrot.lane.b32.xlu0 %v3354_v23, %s3211_s22 }
  0xf9   : > { %2811 = vmatprep.subr.bf16.mxu1 %v2810_v6 }
  0xfa   : > { %v2938_v17 = vpack.c.bf16 %v1276_v11, %v1275_v14  ;;  %2813 = vmatpush3.bf16.msra.mxu1 %v2810_v6  ;;  %v249_v18 = vpop.permute.xlu1 %248  ;;  %v247_v15 = vpop.permute.xlu0 %246  ;;  %v1284_v6 = vld [vmem:[#allocation2 + $0x160] sm:$0xff] }
  0xfb   : > { %v282_v16 = vsel %vm266_vm1, 0.0, %v249_v18  ;;  %v281_v19 = vsel %vm266_vm1, 0.0, %v247_v15  ;;  %v712_v14 = vld [vmem:[#allocation2 + $0x80] sm:$0xff] }
  0xfc   : > { %v305_v20 = vmul.f32 %v3544_v60, %v282_v16  ;;  %v304_v21 = vmul.f32 %v3544_v60, %v281_v19  ;;  %1634 = vrot.lane.b32.xlu1 %v3351_v22, %s3212_s23  ;;  %1632 = vrot.lane.b32.xlu0 %v3354_v23, %s3212_s23  ;;  %v3682_v22 = vld [vmem:[%s3924_s1 + $0x2] ss:$0 sm:$0xff]  ;;  %v1287_v16 = vld [vmem:[#allocation2 + $0x178] sm:$0xff] }
  0xfd   : > { %2939 = vmatprep.subr.bf16.mxu0 %v2938_v17 }
  0xfe   : > { %v2814_v24 = vpack.c.bf16 %v305_v20, %v304_v21  ;;  %2941 = vmatpush3.bf16.msra.mxu0 %v2938_v17  ;;  %v1221_v25 = vpop.permute.xlu1 %1220  ;;  %v1219_v26 = vpop.permute.xlu0 %1218 }
  0xff   : > { %v1254_v29 = vsel %vm1238_vm2, %v1221_v25, 0.0  ;;  %v1253_v30 = vsel %vm1238_vm2, %v1219_v26, 0.0 }
 0x100   : > { %v1278_v31 = vmul.f32 %v3557_v8, %v1254_v29  ;;  %v1277_v34 = vmul.f32 %v3557_v8, %v1253_v30  ;;  %859 = vrot.lane.b32.xlu1 %v3363_v27, %s3211_s22  ;;  %857 = vrot.lane.b32.xlu0 %v3366_v28, %s3211_s22  ;;  %v3151_v29 = vld [vmem:[%s3287_s6 + $0x28] sm:$0xff]  ;;  %v3152_v30 = vld [vmem:[%s3287_s6 + $0x20] sm:$0xff] }
 0x101   : > { %2815 = vmatprep.subr.bf16.mxu1 %v2814_v24 }
 0x102   : > { %v2942_v23 = vpack.c.bf16 %v1278_v31, %v1277_v34  ;;  %2817 = vmatpush3.bf16.msra.mxu1 %v2814_v24  ;;  %v625_v60 = vpop.permute.xlu1 %624  ;;  %v623_v35 = vpop.permute.xlu0 %622  ;;  %v1491_v24 = vld [vmem:[#allocation2 + $0x180] sm:$0xff] }
 0x103   : > { %v672_v8 = vsel %vm670_vm3, 0.0, %v625_v60  ;;  %v671_v37 = vsel %vm670_vm3, 0.0, %v623_v35 }
 0x104   : > { %v696_v39 = vmul.f32 %v3682_v22, %v672_v8  ;;  %v695_v40 = vmul.f32 %v3682_v22, %v671_v37  ;;  %1638 = vrot.lane.b32.xlu1 %v3363_v27, %s3212_s23  ;;  %1636 = vrot.lane.b32.xlu0 %v3366_v28, %s3212_s23  ;;  %v3153_v37 = vld [vmem:[%s3287_s6 + $0x38] sm:$0xff] }
 0x105   : > { %2943 = vmatprep.subr.bf16.mxu0 %v2942_v23  ;;  %2435 = vmatmul.mubr.f32.vlgmr.msra.gmra.mrb[0].mxu1 %v307_v36 }
 0x106   : > { %v2818_v42 = vpack.c.bf16 %v696_v39, %v695_v40  ;;  %2945 = vmatpush3.bf16.msra.mxu0 %v2942_v23  ;;  %v1404_v43 = vpop.permute.xlu1 %1403  ;;  %v1402_v44 = vpop.permute.xlu0 %1401  ;;  %2437 = vmatprep.mubr.f32.mxu1 %v308_v38  ;;  %v3154_v38 = vld [vmem:[%s3287_s6 + $0x30] sm:$0xff] }
 0x107   : > { %v1451_v5 = vsel %vm1449_vm4, %v1404_v43, 0.0  ;;  %v1450_v27 = vsel %vm1449_vm4, %v1402_v44, 0.0 }
 0x108   : > { %v1475_v28 = vmul.f32 %v3695_v41, %v1451_v5  ;;  %v1474_v46 = vmul.f32 %v3695_v41, %v1450_v27  ;;  %863 = vrot.lane.b32.xlu1 %v3375_v32, %s3211_s22  ;;  %861 = vrot.lane.b32.xlu0 %v3378_v33, %s3211_s22  ;;  %v3155_v27 = vld [vmem:[%s3287_s6 + $0x48] sm:$0xff] }
 0x109   : > { %2819 = vmatprep.subr.bf16.mxu1 %v2818_v42  ;;  %2611 = vmatmul.mubr.f32.vlgmr.msra.gmra.mrb[0].mxu0 %v1281_v4 }
 0x10a   : > { %v2946_v48 = vpack.c.bf16 %v1475_v28, %v1474_v46  ;;  %2821 = vmatpush3.bf16.msra.mxu1 %v2818_v42  ;;  %v629_v49 = vpop.permute.xlu1 %628  ;;  %v627_v50 = vpop.permute.xlu0 %626  ;;  %2613 = vmatprep.mubr.f32.mxu0 %v1282_v45  ;;  %v3156_v45 = vld [vmem:[%s3287_s6 + $0x40] sm:$0xff] }
 0x10b   : > { %v674_v52 = vsel %vm670_vm3, 0.0, %v629_v49  ;;  %v673_v54 = vsel %vm670_vm3, 0.0, %v627_v50  ;;  %2438 = vmatmul.mubr.f32.gmra.mrb[2].mxu1 %v309_v47 }
 0x10c   : > { %v698_v55 = vmul.f32 %v3682_v22, %v674_v52  ;;  %v697_v56 = vmul.f32 %v3682_v22, %v673_v54  ;;  %1642 = vrot.lane.b32.xlu1 %v3375_v32, %s3212_s23  ;;  %1640 = vrot.lane.b32.xlu0 %v3378_v33, %s3212_s23  ;;  %v3157_v52 = vld [vmem:[%s3287_s6 + $0x58] sm:$0xff]  ;;  %v3158_v54 = vld [vmem:[%s3287_s6 + $0x50] sm:$0xff] }
 0x10d   : > { %2947 = vmatprep.subr.bf16.mxu0 %v2946_v48  ;;  %2440 = vmatprep.mubr.f32.mxu1 %v310_v51 }
 0x10e   : > { %v2822_v13 = vpack.c.bf16 %v698_v55, %v697_v56  ;;  %2949 = vmatpush3.bf16.msra.mxu0 %v2946_v48  ;;  %v1408_v58 = vpop.permute.xlu1 %1407  ;;  %v1406_v59 = vpop.permute.xlu0 %1405 }
 0x10f   : > { %v1453_v62 = vsel %vm1449_vm4, %v1408_v58, 0.0  ;;  %v1452_v63 = vsel %vm1449_vm4, %v1406_v59, 0.0  ;;  %2441 = vmatmul.mubr.f32.gmra.mrb[4].mxu1 %v311_v57  ;;  %2614 = vmatmul.mubr.f32.gmra.mrb[2].mxu0 %v1283_v12 }
 0x110   : > { %v1477_v32 = vmul.f32 %v3695_v41, %v1453_v62  ;;  %v1476_v33 = vmul.f32 %v3695_v41, %v1452_v63  ;;  %1825 = vrot.lane.b32.xlu1 %v3303_v3, %s3213_s28  ;;  %1823 = vrot.lane.b32.xlu0 %v3293_v1, %s3213_s28  ;;  %v1286_v3 = vld [vmem:[#allocation2 + $0x170] sm:$0xff]  ;;  %v3160_v62 = vld [vmem:[%s3287_s6 + $0x60] sm:$0xff] }
 0x111   : > { %2823 = vmatprep.subr.bf16.mxu1 %v2822_v13  ;;  %2443 = vmatprep.mubr.f32.mxu1 %v312_v61  ;;  %v3159_v61 = vld [vmem:[%s3287_s6 + $0x68] sm:$0xff] }
 0x112   : > { %v2950_v9 = vpack.c.bf16 %v1477_v32, %v1476_v33  ;;  %2825 = vmatpush3.bf16.msra.mxu1 %v2822_v13  ;;  %v633_v10 = vpop.permute.xlu1 %632  ;;  %v631_v11 = vpop.permute.xlu0 %630  ;;  %2616 = vmatprep.mubr.f32.mxu0 %v1284_v6 }
 0x113   : > { %v676_v17 = vsel %vm670_vm3, 0.0, %v633_v10  ;;  %v675_v18 = vsel %vm670_vm3, 0.0, %v631_v11  ;;  %2444 = vmatmul.mubr.f32.gmra.mrb[6].mxu1 %v313_v53  ;;  %2617 = vmatmul.mubr.f32.gmra.mrb[4].mxu0 %v1285_v7  ;;  %v3161_v10 = vld [vmem:[%s3287_s6 + $0x78] sm:$0xff]  ;;  %v3162_v11 = vld [vmem:[%s3287_s6 + $0x70] sm:$0xff] }
 0x114   : > { %v700_v15 = vmul.f32 %v3682_v22, %v676_v17  ;;  %v699_v1 = vmul.f32 %v3682_v22, %v675_v18  ;;  %1829 = vrot.lane.b32.xlu1 %v3300_v2, %s3213_s28  ;;  %1827 = vrot.lane.b32.xlu0 %v3290_v0, %s3213_s28 }
 0x115   : > { %2951 = vmatprep.subr.bf16.mxu0 %v2950_v9  ;;  %2478 = vmatprep.mubr.f32.mxu1 %v712_v14 }
 0x116   : > { %v2826_v19 = vpack.c.bf16 %v700_v15, %v699_v1  ;;  %2953 = vmatpush3.bf16.msra.mxu0 %v2950_v9  ;;  %v1412_v20 = vpop.permute.xlu1 %1411  ;;  %v1410_v21 = vpop.permute.xlu0 %1409  ;;  %2619 = vmatprep.mubr.f32.mxu0 %v1286_v3 }
 0x117   : > { %v1455_v25 = vsel %vm1449_vm4, %v1412_v20, 0.0  ;;  %v1454_v26 = vsel %vm1449_vm4, %v1410_v21, 0.0  ;;  %2620 = vmatmul.mubr.f32.gmra.mrb[6].mxu0 %v1287_v16 }
 0x118   : > { %v1479_v2 = vmul.f32 %v3695_v41, %v1455_v25  ;;  %v1478_v0 = vmul.f32 %v3695_v41, %v1454_v26  ;;  %1833 = vrot.lane.b32.xlu1 %v3151_v29, %s3213_s28  ;;  %1831 = vrot.lane.b32.xlu0 %v3152_v30, %s3213_s28 }
 0x119   : > { %2827 = vmatprep.subr.bf16.mxu1 %v2826_v19  ;;  %2654 = vmatprep.mubr.f32.mxu0 %v1491_v24 }
 0x11a   : > { %v2954_v31 = vpack.c.bf16 %v1479_v2, %v1478_v0  ;;  %2829 = vmatpush3.bf16.msra.mxu1 %v2826_v19  ;;  %v637_v34 = vpop.permute.xlu1 %636  ;;  %v635_v23 = vpop.permute.xlu0 %634 }
 0x11b   : > { %v678_v60 = vsel %vm670_vm3, 0.0, %v637_v34  ;;  %v677_v35 = vsel %vm670_vm3, 0.0, %v635_v23 }
 0x11c   : > { %v702_v36 = vmul.f32 %v3682_v22, %v678_v60  ;;  %v701_v8 = vmul.f32 %v3682_v22, %v677_v35  ;;  %1837 = vrot.lane.b32.xlu1 %v3153_v37, %s3213_s28  ;;  %1835 = vrot.lane.b32.xlu0 %v3154_v38, %s3213_s28 }
 0x11d   : > { %2955 = vmatprep.subr.bf16.mxu0 %v2954_v31 }
 0x11e   : > { %v2830_v39 = vpack.c.bf16 %v702_v36, %v701_v8  ;;  %2957 = vmatpush3.bf16.msra.mxu0 %v2954_v31  ;;  %v1416_v40 = vpop.permute.xlu1 %1415  ;;  %v1414_v42 = vpop.permute.xlu0 %1413 }
 0x11f   : > { %v1457_v43 = vsel %vm1449_vm4, %v1416_v40, 0.0  ;;  %v1456_v44 = vsel %vm1449_vm4, %v1414_v42, 0.0 }
 0x120   : > { %v1481_v4 = vmul.f32 %v3695_v41, %v1457_v43  ;;  %v1480_v5 = vmul.f32 %v3695_v41, %v1456_v44  ;;  %1841 = vrot.lane.b32.xlu1 %v3155_v27, %s3213_s28  ;;  %1839 = vrot.lane.b32.xlu0 %v3156_v45, %s3213_s28 }
 0x121   : > { %2831 = vmatprep.subr.bf16.mxu1 %v2830_v39 }
 0x122   : > { %v2958_v28 = vpack.c.bf16 %v1481_v4, %v1480_v5  ;;  %2833 = vmatpush3.bf16.msra.mxu1 %v2830_v39  ;;  %v641_v46 = vpop.permute.xlu1 %640  ;;  %v639_v47 = vpop.permute.xlu0 %638 }
 0x123   : > { %v680_v48 = vsel %vm670_vm3, 0.0, %v641_v46  ;;  %v679_v49 = vsel %vm670_vm3, 0.0, %v639_v47 }
 0x124   : > { %v704_v50 = vmul.f32 %v3682_v22, %v680_v48  ;;  %v703_v51 = vmul.f32 %v3682_v22, %v679_v49  ;;  %1845 = vrot.lane.b32.xlu1 %v3157_v52, %s3213_s28  ;;  %1843 = vrot.lane.b32.xlu0 %v3158_v54, %s3213_s28  ;;  %v714_v49 = vld [vmem:[#allocation2 + $0x90] sm:$0xff]  ;;  %v3809_v54 = vld [vmem:[%s3924_s1 + $0x7] ss:$0 sm:$0xff] }
 0x125   : > { %2959 = vmatprep.subr.bf16.mxu0 %v2958_v28 }
 0x126   : > { %v2834_v55 = vpack.c.bf16 %v704_v50, %v703_v51  ;;  %2961 = vmatpush3.bf16.msra.mxu0 %v2958_v28  ;;  %v1420_v56 = vpop.permute.xlu1 %1419  ;;  %v1418_v57 = vpop.permute.xlu0 %1417  ;;  %v713_v28 = vld [vmem:[#allocation2 + $0x88] sm:$0xff] }
 0x127   : > { %v1459_v12 = vsel %vm1449_vm4, %v1420_v56, 0.0  ;;  %v1458_v13 = vsel %vm1449_vm4, %v1418_v57, 0.0 }
 0x128   : > { %v1483_v58 = vmul.f32 %v3695_v41, %v1459_v12  ;;  %v1482_v59 = vmul.f32 %v3695_v41, %v1458_v13  ;;  %1849 = vrot.lane.b32.xlu1 %v3159_v61, %s3213_s28  ;;  %1847 = vrot.lane.b32.xlu0 %v3160_v62, %s3213_s28  ;;  %v1493_v13 = vld [vmem:[#allocation2 + $0x190] sm:$0xff]  ;;  %v715_v61 = vld [vmem:[#allocation2 + $0x98] sm:$0xff] }
 0x129   : > { %2835 = vmatprep.subr.bf16.mxu1 %v2834_v55 }
 0x12a   : > { %v2962_v63 = vpack.c.bf16 %v1483_v58, %v1482_v59  ;;  %2837 = vmatpush3.bf16.msra.mxu1 %v2834_v55  ;;  %v645_v6 = vpop.permute.xlu1 %644  ;;  %v643_v32 = vpop.permute.xlu0 %642  ;;  %v1492_v55 = vld [vmem:[#allocation2 + $0x188] sm:$0xff] }
 0x12b   : > { %v682_v33 = vsel %vm670_vm3, 0.0, %v645_v6  ;;  %v681_v53 = vsel %vm670_vm3, 0.0, %v643_v32  ;;  %v716_v6 = vld [vmem:[#allocation2 + $0xa0] sm:$0xff]  ;;  %v1494_v32 = vld [vmem:[#allocation2 + $0x198] sm:$0xff] }
 0x12c   : > { %v706_v7 = vmul.f32 %v3682_v22, %v682_v33  ;;  %v705_v9 = vmul.f32 %v3682_v22, %v681_v53  ;;  %1853 = vrot.lane.b32.xlu1 %v3161_v10, %s3213_s28  ;;  %1851 = vrot.lane.b32.xlu0 %v3162_v11, %s3213_s28 }
 0x12d   : > { %2963 = vmatprep.subr.bf16.mxu0 %v2962_v63 }
 0x12e   : > { %v2838_v14 = vpack.c.bf16 %v706_v7, %v705_v9  ;;  %2965 = vmatpush3.bf16.msra.mxu0 %v2962_v63  ;;  %v1424_v17 = vpop.permute.xlu1 %1423  ;;  %v1422_v18 = vpop.permute.xlu0 %1421  ;;  %v1495_v9 = vld [vmem:[#allocation2 + $0x1a0] sm:$0xff] }
 0x12f   : > { %v1461_v3 = vsel %vm1449_vm4, %v1424_v17, 0.0  ;;  %v1460_v15 = vsel %vm1449_vm4, %v1422_v18, 0.0 }
 0x130   : > { %v1485_v1 = vmul.f32 %v3695_v41, %v1461_v3  ;;  %v1484_v16 = vmul.f32 %v3695_v41, %v1460_v15  ;;  %2839 = vmatprep.subr.bf16.mxu1 %v2838_v14  ;;  %v718_v3 = vld [vmem:[#allocation2 + $0xb0] sm:$0xff]  ;;  %v1496_v15 = vld [vmem:[#allocation2 + $0x1a8] sm:$0xff] }
 0x131   : > { %2841 = vmatpush3.bf16.msra.mxu1 %v2838_v14  ;;  %v717_v14 = vld [vmem:[#allocation2 + $0xa8] sm:$0xff] }
 0x132   : > { %v2966_v19 = vpack.c.bf16 %v1485_v1, %v1484_v16  ;;  %v649_v20 = vpop.permute.xlu1 %648  ;;  %v647_v21 = vpop.permute.xlu0 %646 }
 0x133   : > { %v684_v24 = vsel %vm670_vm3, 0.0, %v649_v20  ;;  %v683_v25 = vsel %vm670_vm3, 0.0, %v647_v21  ;;  %v1497_v20 = vld [vmem:[#allocation2 + $0x1b0] sm:$0xff] }
 0x134   : > { %v708_v26 = vmul.f32 %v3682_v22, %v684_v24  ;;  %v707_v2 = vmul.f32 %v3682_v22, %v683_v25  ;;  %2967 = vmatprep.subr.bf16.mxu0 %v2966_v19  ;;  %v719_v25 = vld [vmem:[#allocation2 + $0xb8] sm:$0xff] }
 0x135   : > { %2969 = vmatpush3.bf16.msra.mxu0 %v2966_v19 }
 0x136   : > { %v2842_v0 = vpack.c.bf16 %v708_v26, %v707_v2  ;;  %v1428_v29 = vpop.permute.xlu1 %1427  ;;  %v1426_v30 = vpop.permute.xlu0 %1425 }
 0x137   : > { %v1463_v31 = vsel %vm1449_vm4, %v1428_v29, 0.0  ;;  %v1462_v34 = vsel %vm1449_vm4, %v1426_v30, 0.0  ;;  %v1498_v29 = vld [vmem:[#allocation2 + $0x1b8] sm:$0xff] }
 0x138   : > { %v1487_v23 = vmul.f32 %v3695_v41, %v1463_v31  ;;  %v1486_v60 = vmul.f32 %v3695_v41, %v1462_v34  ;;  %2843 = vmatprep.subr.bf16.mxu1 %v2842_v0 }
 0x139   : > { %2845 = vmatpush3.bf16.msra.mxu1 %v2842_v0  ;;  %v923_v0 = vld [vmem:[#allocation2 + $0xc0] sm:$0xff] }
 0x13a   : > { %v2970_v35 = vpack.c.bf16 %v1487_v23, %v1486_v60  ;;  %v653_v36 = vpop.permute.xlu1 %652  ;;  %v651_v8 = vpop.permute.xlu0 %650  ;;  %v1702_v23 = vld [vmem:[#allocation2 + $0x1c0] sm:$0xff] }
 0x13b   : > { %v686_v37 = vsel %vm670_vm3, 0.0, %v653_v36  ;;  %v685_v38 = vsel %vm670_vm3, 0.0, %v651_v8 }
 0x13c   : > { %v710_v39 = vmul.f32 %v3682_v22, %v686_v37  ;;  %v709_v40 = vmul.f32 %v3682_v22, %v685_v38  ;;  %2971 = vmatprep.subr.bf16.mxu0 %v2970_v35  ;;  %v3800_v22 = vld [vmem:[%s3924_s1 + $0x3] ss:$0 sm:$0xff] }
 0x13d   : > { %2973 = vmatpush3.bf16.msra.mxu0 %v2970_v35 }
 0x13e   : > { %v2846_v42 = vpack.c.bf16 %v710_v39, %v709_v40  ;;  %v1432_v43 = vpop.permute.xlu1 %1431  ;;  %v1430_v44 = vpop.permute.xlu0 %1429 }
 0x13f   : > { %v1465_v4 = vsel %vm1449_vm4, %v1432_v43, 0.0  ;;  %v1464_v5 = vsel %vm1449_vm4, %v1430_v44, 0.0 }
 0x140   : > { %v1489_v27 = vmul.f32 %v3695_v41, %v1465_v4  ;;  %v1488_v45 = vmul.f32 %v3695_v41, %v1464_v5  ;;  %2847 = vmatprep.subr.bf16.mxu1 %v2846_v42 }
 0x141   : > { %2849 = vmatpush3.bf16.msra.mxu1 %v2846_v42 }
 0x142   : > { %v2974_v46 = vpack.c.bf16 %v1489_v27, %v1488_v45  ;;  %v836_v47 = vpop.permute.xlu1 %835  ;;  %v834_v48 = vpop.permute.xlu0 %833 }
 0x143   : > { %v883_v50 = vsel %vm881_vm5, 0.0, %v836_v47  ;;  %v882_v51 = vsel %vm881_vm5, 0.0, %v834_v48 }
 0x144   : > { %v907_v52 = vmul.f32 %v3800_v22, %v883_v50  ;;  %v906_v41 = vmul.f32 %v3800_v22, %v882_v51  ;;  %2975 = vmatprep.subr.bf16.mxu0 %v2974_v46  ;;  %2479 = vmatmul.mubr.f32.vlgmr.msra.gmra.mrb[0].mxu1 %v713_v28 }
 0x145   : > { %2977 = vmatpush3.bf16.msra.mxu0 %v2974_v46  ;;  %2481 = vmatprep.mubr.f32.mxu1 %v714_v49 }
 0x146   : > { %v2850_v56 = vpack.c.bf16 %v907_v52, %v906_v41  ;;  %v1615_v57 = vpop.permute.xlu1 %1614  ;;  %v1613_v12 = vpop.permute.xlu0 %1612 }
 0x147   : > { %v1662_v58 = vsel %vm1660_vm6, %v1615_v57, 0.0  ;;  %v1661_v59 = vsel %vm1660_vm6, %v1613_v12, 0.0 }
 0x148   : > { %v1686_v62 = vmul.f32 %v3809_v54, %v1662_v58  ;;  %v1685_v63 = vmul.f32 %v3809_v54, %v1661_v59  ;;  %2851 = vmatprep.subr.bf16.mxu1 %v2850_v56  ;;  %2655 = vmatmul.mubr.f32.vlgmr.msra.gmra.mrb[0].mxu0 %v1492_v55 }
 0x149   : > { %2853 = vmatpush3.bf16.msra.mxu1 %v2850_v56  ;;  %2657 = vmatprep.mubr.f32.mxu0 %v1493_v13 }
 0x14a   : > { %v2978_v33 = vpack.c.bf16 %v1686_v62, %v1685_v63  ;;  %v840_v53 = vpop.permute.xlu1 %839  ;;  %v838_v7 = vpop.permute.xlu0 %837  ;;  %2482 = vmatmul.mubr.f32.gmra.mrb[2].mxu1 %v715_v61 }
 0x14b   : > { %v885_v10 = vsel %vm881_vm5, 0.0, %v840_v53  ;;  %v884_v11 = vsel %vm881_vm5, 0.0, %v838_v7  ;;  %2484 = vmatprep.mubr.f32.mxu1 %v716_v6 }
 0x14c   : > { %v909_v17 = vmul.f32 %v3800_v22, %v885_v10  ;;  %v908_v18 = vmul.f32 %v3800_v22, %v884_v11  ;;  %2979 = vmatprep.subr.bf16.mxu0 %v2978_v33  ;;  %2658 = vmatmul.mubr.f32.gmra.mrb[2].mxu0 %v1494_v32 }
 0x14d   : > { %2981 = vmatpush3.bf16.msra.mxu0 %v2978_v33  ;;  %2660 = vmatprep.mubr.f32.mxu0 %v1495_v9 }
 0x14e   : > { %v2854_v1 = vpack.c.bf16 %v909_v17, %v908_v18  ;;  %v1619_v16 = vpop.permute.xlu1 %1618  ;;  %v1617_v19 = vpop.permute.xlu0 %1616  ;;  %2485 = vmatmul.mubr.f32.gmra.mrb[4].mxu1 %v717_v14 }
 0x14f   : > { %v1664_v21 = vsel %vm1660_vm6, %v1619_v16, 0.0  ;;  %v1663_v24 = vsel %vm1660_vm6, %v1617_v19, 0.0  ;;  %2487 = vmatprep.mubr.f32.mxu1 %v718_v3 }
 0x150   : > { %v1688_v26 = vmul.f32 %v3809_v54, %v1664_v21  ;;  %v1687_v2 = vmul.f32 %v3809_v54, %v1663_v24  ;;  %2855 = vmatprep.subr.bf16.mxu1 %v2854_v1  ;;  %2661 = vmatmul.mubr.f32.gmra.mrb[4].mxu0 %v1496_v15 }
 0x151   : > { %2857 = vmatpush3.bf16.msra.mxu1 %v2854_v1  ;;  %2663 = vmatprep.mubr.f32.mxu0 %v1497_v20 }
 0x152   : > { %v2982_v30 = vpack.c.bf16 %v1688_v26, %v1687_v2  ;;  %v844_v31 = vpop.permute.xlu1 %843  ;;  %v842_v34 = vpop.permute.xlu0 %841  ;;  %2488 = vmatmul.mubr.f32.gmra.mrb[6].mxu1 %v719_v25 }
 0x153   : > { %v887_v60 = vsel %vm881_vm5, 0.0, %v844_v31  ;;  %v886_v35 = vsel %vm881_vm5, 0.0, %v842_v34  ;;  %2522 = vmatprep.mubr.f32.mxu1 %v923_v0 }
 0x154   : > { %v911_v36 = vmul.f32 %v3800_v22, %v887_v60  ;;  %v910_v8 = vmul.f32 %v3800_v22, %v886_v35  ;;  %2983 = vmatprep.subr.bf16.mxu0 %v2982_v30  ;;  %2664 = vmatmul.mubr.f32.gmra.mrb[6].mxu0 %v1498_v29 }
 0x155   : > { %2985 = vmatpush3.bf16.msra.mxu0 %v2982_v30  ;;  %2698 = vmatprep.mubr.f32.mxu0 %v1702_v23 }
 0x156   : > { %v2858_v37 = vpack.c.bf16 %v911_v36, %v910_v8  ;;  %v1623_v38 = vpop.permute.xlu1 %1622  ;;  %v1621_v39 = vpop.permute.xlu0 %1620 }
 0x157   : > { %v1666_v40 = vsel %vm1660_vm6, %v1623_v38, 0.0  ;;  %v1665_v42 = vsel %vm1660_vm6, %v1621_v39, 0.0 }
 0x158   : > { %v1690_v43 = vmul.f32 %v3809_v54, %v1666_v40  ;;  %v1689_v44 = vmul.f32 %v3809_v54, %v1665_v42  ;;  %2859 = vmatprep.subr.bf16.mxu1 %v2858_v37 }
 0x159   : > { %2861 = vmatpush3.bf16.msra.mxu1 %v2858_v37 }
 0x15a   : > { %v2986_v4 = vpack.c.bf16 %v1690_v43, %v1689_v44  ;;  %v848_v5 = vpop.permute.xlu1 %847  ;;  %v846_v27 = vpop.permute.xlu0 %845 }
 0x15b   : > { %v889_v45 = vsel %vm881_vm5, 0.0, %v848_v5  ;;  %v888_v28 = vsel %vm881_vm5, 0.0, %v846_v27 }
 0x15c   : > { %v913_v46 = vmul.f32 %v3800_v22, %v889_v45  ;;  %v912_v47 = vmul.f32 %v3800_v22, %v888_v28  ;;  %2987 = vmatprep.subr.bf16.mxu0 %v2986_v4 }
 0x15d   : > { %2989 = vmatpush3.bf16.msra.mxu0 %v2986_v4 }
 0x15e   : > { %v2862_v48 = vpack.c.bf16 %v913_v46, %v912_v47  ;;  %v1627_v49 = vpop.permute.xlu1 %1626  ;;  %v1625_v50 = vpop.permute.xlu0 %1624 }
 0x15f   : > { %v1668_v51 = vsel %vm1660_vm6, %v1627_v49, 0.0  ;;  %v1667_v52 = vsel %vm1660_vm6, %v1625_v50, 0.0  ;;  %v924_v49 = vld [vmem:[#allocation2 + $0xc8] sm:$0xff] }
 0x160   : > { %v1692_v41 = vmul.f32 %v3809_v54, %v1668_v51  ;;  %v1691_v55 = vmul.f32 %v3809_v54, %v1667_v52  ;;  %2863 = vmatprep.subr.bf16.mxu1 %v2862_v48 }
 0x161   : > { %2865 = vmatpush3.bf16.msra.mxu1 %v2862_v48 }
 0x162   : > { %v2990_v56 = vpack.c.bf16 %v1692_v41, %v1691_v55  ;;  %v852_v57 = vpop.permute.xlu1 %851  ;;  %v850_v12 = vpop.permute.xlu0 %849  ;;  %v925_v41 = vld [vmem:[#allocation2 + $0xd0] sm:$0xff] }
 0x163   : > { %v891_v13 = vsel %vm881_vm5, 0.0, %v852_v57  ;;  %v890_v58 = vsel %vm881_vm5, 0.0, %v850_v12  ;;  %v926_v12 = vld [vmem:[#allocation2 + $0xd8] sm:$0xff] }
 0x164   : > { %v915_v59 = vmul.f32 %v3800_v22, %v891_v13  ;;  %v914_v61 = vmul.f32 %v3800_v22, %v890_v58  ;;  %2991 = vmatprep.subr.bf16.mxu0 %v2990_v56  ;;  %v1703_v13 = vld [vmem:[#allocation2 + $0x1c8] sm:$0xff] }
 0x165   : > { %2993 = vmatpush3.bf16.msra.mxu0 %v2990_v56 }
 0x166   : > { %v2866_v62 = vpack.c.bf16 %v915_v59, %v914_v61  ;;  %v1631_v63 = vpop.permute.xlu1 %1630  ;;  %v1629_v6 = vpop.permute.xlu0 %1628 }
 0x167   : > { %v1670_v32 = vsel %vm1660_vm6, %v1631_v63, 0.0  ;;  %v1669_v33 = vsel %vm1660_vm6, %v1629_v6, 0.0 }
 0x168   : > { %v1694_v53 = vmul.f32 %v3809_v54, %v1670_v32  ;;  %v1693_v7 = vmul.f32 %v3809_v54, %v1669_v33  ;;  %2867 = vmatprep.subr.bf16.mxu1 %v2866_v62  ;;  %v927_v33 = vld [vmem:[#allocation2 + $0xe0] sm:$0xff] }
 0x169   : > { %2869 = vmatpush3.bf16.msra.mxu1 %v2866_v62 }
 0x16a   : > { %v2994_v9 = vpack.c.bf16 %v1694_v53, %v1693_v7  ;;  %v856_v10 = vpop.permute.xlu1 %855  ;;  %v854_v11 = vpop.permute.xlu0 %853  ;;  %v1704_v53 = vld [vmem:[#allocation2 + $0x1d0] sm:$0xff]  ;;  %v928_v7 = vld [vmem:[#allocation2 + $0xe8] sm:$0xff] }
 0x16b   : > { %v893_v14 = vsel %vm881_vm5, 0.0, %v856_v10  ;;  %v892_v17 = vsel %vm881_vm5, 0.0, %v854_v11 }
 0x16c   : > { %v917_v18 = vmul.f32 %v3800_v22, %v893_v14  ;;  %v916_v3 = vmul.f32 %v3800_v22, %v892_v17  ;;  %2995 = vmatprep.subr.bf16.mxu0 %v2994_v9 }
 0x16d   : > { %2997 = vmatpush3.bf16.msra.mxu0 %v2994_v9  ;;  %v1705_v9 = vld [vmem:[#allocation2 + $0x1d8] sm:$0xff] }
 0x16e   : > { %v2870_v15 = vpack.c.bf16 %v917_v18, %v916_v3  ;;  %v1635_v1 = vpop.permute.xlu1 %1634  ;;  %v1633_v16 = vpop.permute.xlu0 %1632 }
 0x16f   : > { %v1672_v19 = vsel %vm1660_vm6, %v1635_v1, 0.0  ;;  %v1671_v20 = vsel %vm1660_vm6, %v1633_v16, 0.0  ;;  %v929_v1 = vld [vmem:[#allocation2 + $0xf0] sm:$0xff]  ;;  %v1706_v16 = vld [vmem:[#allocation2 + $0x1e0] sm:$0xff] }
 0x170   : > { %v1696_v21 = vmul.f32 %v3809_v54, %v1672_v19  ;;  %v1695_v24 = vmul.f32 %v3809_v54, %v1671_v20  ;;  %2871 = vmatprep.subr.bf16.mxu1 %v2870_v15  ;;  %v930_v19 = vld [vmem:[#allocation2 + $0xf8] sm:$0xff]  ;;  %v1707_v20 = vld [vmem:[#allocation2 + $0x1e8] sm:$0xff] }
 0x171   : > { %2873 = vmatpush3.bf16.msra.mxu1 %v2870_v15 }
 0x172   : > { %v2998_v25 = vpack.c.bf16 %v1696_v21, %v1695_v24  ;;  %v860_v26 = vpop.permute.xlu1 %859  ;;  %v858_v2 = vpop.permute.xlu0 %857 }
 0x173   : > { %v895_v0 = vsel %vm881_vm5, 0.0, %v860_v26  ;;  %v894_v29 = vsel %vm881_vm5, 0.0, %v858_v2 }
 0x174   : > { %v919_v30 = vmul.f32 %v3800_v22, %v895_v0  ;;  %v918_v31 = vmul.f32 %v3800_v22, %v894_v29  ;;  %2999 = vmatprep.subr.bf16.mxu0 %v2998_v25 }
 0x175   : > { %3001 = vmatpush3.bf16.msra.mxu0 %v2998_v25 }
 0x176   : > { %v2874_v34 = vpack.c.bf16 %v919_v30, %v918_v31  ;;  %v1639_v23 = vpop.permute.xlu1 %1638  ;;  %v1637_v60 = vpop.permute.xlu0 %1636  ;;  %v1708_v30 = vld [vmem:[#allocation2 + $0x1f0] sm:$0xff]  ;;  %v1917_v31 = vld [vmem:[#allocation2 + $0x220] sm:$0xff] }
 0x177   : > { %v1674_v35 = vsel %vm1660_vm6, %v1639_v23, 0.0  ;;  %v1673_v36 = vsel %vm1660_vm6, %v1637_v60, 0.0 }
 0x178   : > { %v1698_v8 = vmul.f32 %v3809_v54, %v1674_v35  ;;  %v1697_v37 = vmul.f32 %v3809_v54, %v1673_v36  ;;  %2875 = vmatprep.subr.bf16.mxu1 %v2874_v34  ;;  %v1913_v36 = vld [vmem:[#allocation2 + $0x200] sm:$0xff] }
 0x179   : > { %2877 = vmatpush3.bf16.msra.mxu1 %v2874_v34  ;;  %v1709_v34 = vld [vmem:[#allocation2 + $0x1f8] sm:$0xff] }
 0x17a   : > { %v3002_v38 = vpack.c.bf16 %v1698_v8, %v1697_v37  ;;  %v864_v39 = vpop.permute.xlu1 %863  ;;  %v862_v40 = vpop.permute.xlu0 %861 }
 0x17b   : > { %v897_v42 = vsel %vm881_vm5, 0.0, %v864_v39  ;;  %v896_v43 = vsel %vm881_vm5, 0.0, %v862_v40 }
 0x17c   : > { %v921_v44 = vmul.f32 %v3800_v22, %v897_v42  ;;  %v920_v4 = vmul.f32 %v3800_v22, %v896_v43  ;;  %3003 = vmatprep.subr.bf16.mxu0 %v3002_v38  ;;  %v3874_v22 = vld [vmem:[%s3924_s1 + $0x8] ss:$0 sm:$0xff] }
 0x17d   : > { %3005 = vmatpush3.bf16.msra.mxu0 %v3002_v38 }
 0x17e   : > { %v2878_v5 = vpack.c.bf16 %v921_v44, %v920_v4  ;;  %v1643_v27 = vpop.permute.xlu1 %1642  ;;  %v1641_v45 = vpop.permute.xlu0 %1640 }
 0x17f   : > { %v1676_v28 = vsel %vm1660_vm6, %v1643_v27, 0.0  ;;  %v1675_v46 = vsel %vm1660_vm6, %v1641_v45, 0.0 }
 0x180   : > { %v1700_v47 = vmul.f32 %v3809_v54, %v1676_v28  ;;  %v1699_v48 = vmul.f32 %v3809_v54, %v1675_v46  ;;  %2879 = vmatprep.subr.bf16.mxu1 %v2878_v5 }
 0x181   : > { %2881 = vmatpush3.bf16.msra.mxu1 %v2878_v5 }
 0x182   : > { %v3006_v50 = vpack.c.bf16 %v1700_v47, %v1699_v48  ;;  %v1826_v51 = vpop.permute.xlu1 %1825  ;;  %v1824_v52 = vpop.permute.xlu0 %1823 }
 0x183   : > { %v1873_v55 = vsel %vm1871_vm7, %v1826_v51, 0.0  ;;  %v1872_v56 = vsel %vm1871_vm7, %v1824_v52, 0.0 }
 0x184   : > { %v1897_v57 = vmul.f32 %v3874_v22, %v1873_v55  ;;  %v1896_v54 = vmul.f32 %v3874_v22, %v1872_v56  ;;  %2523 = vmatmul.mubr.f32.vlgmr.msra.gmra.mrb[0].mxu1 %v924_v49  ;;  %3007 = vmatprep.subr.bf16.mxu0 %v3006_v50 }
 0x185   : > { %3009 = vmatpush3.bf16.msra.mxu0 %v3006_v50  ;;  %2525 = vmatprep.mubr.f32.mxu1 %v925_v41 }
 0x186   : > { %v3010_v58 = vpack.c.bf16 %v1897_v57, %v1896_v54  ;;  %v1830_v59 = vpop.permute.xlu1 %1829  ;;  %v1828_v61 = vpop.permute.xlu0 %1827 }
 0x187   : > { %v1875_v62 = vsel %vm1871_vm7, %v1830_v59, 0.0  ;;  %v1874_v63 = vsel %vm1871_vm7, %v1828_v61, 0.0  ;;  %v1915_v59 = vld [vmem:[#allocation2 + $0x210] sm:$0xff] }
 0x188   : > { %v1899_v6 = vmul.f32 %v3874_v22, %v1875_v62  ;;  %v1898_v32 = vmul.f32 %v3874_v22, %v1874_v63  ;;  %2526 = vmatmul.mubr.f32.gmra.mrb[2].mxu1 %v926_v12  ;;  %2699 = vmatmul.mubr.f32.vlgmr.msra.gmra.mrb[0].mxu0 %v1703_v13  ;;  %v1914_v13 = vld [vmem:[#allocation2 + $0x208] sm:$0xff]  ;;  %v1919_v61 = vld [vmem:[#allocation2 + $0x230] sm:$0xff]  ;;  %v1916_v62 = vld [vmem:[#allocation2 + $0x218] sm:$0xff] }
 0x189   : > { %3011 = vmatprep.subr.bf16.mxu0 %v3010_v58  ;;  %3042 = vmatprep.subr.bf16.mxu1 %v3010_v58  ;;  %v1920_v63 = vld [vmem:[#allocation2 + $0x238] sm:$0xff] }
 0x18a   : > { %v3014_v10 = vpack.c.bf16 %v1899_v6, %v1898_v32  ;;  %3013 = vmatpush3.bf16.msra.mxu0 %v3010_v58  ;;  %3050 = vmatpush3.bf16.msra.mxu1 %v3010_v58  ;;  %v1834_v11 = vpop.permute.xlu1 %1833  ;;  %v1832_v14 = vpop.permute.xlu0 %1831  ;;  %v1918_v58 = vld [vmem:[#allocation2 + $0x228] sm:$0xff] }
 0x18b   : > { %v1877_v17 = vsel %vm1871_vm7, %v1834_v11, 0.0  ;;  %v1876_v18 = vsel %vm1871_vm7, %v1832_v14, 0.0  ;;  %2528 = vmatprep.mubr.f32.mxu1 %v927_v33  ;;  %2701 = vmatprep.mubr.f32.mxu0 %v1704_v53 }
 0x18c   : > { %v1901_v3 = vmul.f32 %v3874_v22, %v1877_v17  ;;  %v1900_v15 = vmul.f32 %v3874_v22, %v1876_v18  ;;  %2529 = vmatmul.mubr.f32.gmra.mrb[4].mxu1 %v928_v7  ;;  %2702 = vmatmul.mubr.f32.gmra.mrb[2].mxu0 %v1705_v9 }
 0x18d   : > { %3015 = vmatprep.subr.bf16.mxu0 %v3014_v10  ;;  %3043 = vmatprep.subr.bf16.mxu1 %v3014_v10 }
 0x18e   : > { %v3018_v21 = vpack.c.bf16 %v1901_v3, %v1900_v15  ;;  %3017 = vmatpush3.bf16.msra.mxu0 %v3014_v10  ;;  %3051 = vmatpush3.bf16.msra.mxu1 %v3014_v10  ;;  %v1838_v24 = vpop.permute.xlu1 %1837  ;;  %v1836_v25 = vpop.permute.xlu0 %1835 }
 0x18f   : > { %v1879_v26 = vsel %vm1871_vm7, %v1838_v24, 0.0  ;;  %v1878_v2 = vsel %vm1871_vm7, %v1836_v25, 0.0  ;;  %2531 = vmatprep.mubr.f32.mxu1 %v929_v1  ;;  %2704 = vmatprep.mubr.f32.mxu0 %v1706_v16 }
 0x190   : > { %v1903_v0 = vmul.f32 %v3874_v22, %v1879_v26  ;;  %v1902_v29 = vmul.f32 %v3874_v22, %v1878_v2  ;;  %2532 = vmatmul.mubr.f32.gmra.mrb[6].mxu1 %v930_v19  ;;  %2705 = vmatmul.mubr.f32.gmra.mrb[4].mxu0 %v1707_v20 }
 0x191   : > { %3019 = vmatprep.subr.bf16.mxu0 %v3018_v21  ;;  %3044 = vmatprep.subr.bf16.mxu1 %v3018_v21 }
 0x192   : > { %v3022_v23 = vpack.c.bf16 %v1903_v0, %v1902_v29  ;;  %3021 = vmatpush3.bf16.msra.mxu0 %v3018_v21  ;;  %3052 = vmatpush3.bf16.msra.mxu1 %v3018_v21  ;;  %v1842_v60 = vpop.permute.xlu1 %1841  ;;  %v1840_v35 = vpop.permute.xlu0 %1839 }
 0x193   : > { %v1881_v8 = vsel %vm1871_vm7, %v1842_v60, 0.0  ;;  %v1880_v37 = vsel %vm1871_vm7, %v1840_v35, 0.0  ;;  %2707 = vmatprep.mubr.f32.mxu0 %v1708_v30  ;;  %2748 = vmatprep.mubr.f32.mxu1 %v1917_v31 }
 0x194   : > { %v1905_v38 = vmul.f32 %v3874_v22, %v1881_v8  ;;  %v1904_v39 = vmul.f32 %v3874_v22, %v1880_v37  ;;  %2708 = vmatmul.mubr.f32.gmra.mrb[6].mxu0 %v1709_v34  ;;  %3023 = vmatprep.subr.bf16.mxu0 %v3022_v23 }
 0x195   : > { %3045 = vmatprep.subr.bf16.mxu1 %v3022_v23  ;;  %2742 = vmatprep.mubr.f32.mxu0 %v1913_v36 }
 0x196   : > { %v3026_v40 = vpack.c.bf16 %v1905_v38, %v1904_v39  ;;  %3025 = vmatpush3.bf16.msra.mxu0 %v3022_v23  ;;  %3053 = vmatpush3.bf16.msra.mxu1 %v3022_v23  ;;  %v1846_v42 = vpop.permute.xlu1 %1845  ;;  %v1844_v43 = vpop.permute.xlu0 %1843 }
 0x197   : > { %v1883_v44 = vsel %vm1871_vm7, %v1846_v42, 0.0  ;;  %v1882_v4 = vsel %vm1871_vm7, %v1844_v43, 0.0 }
 0x198   : > { %v1907_v5 = vmul.f32 %v3874_v22, %v1883_v44  ;;  %v1906_v27 = vmul.f32 %v3874_v22, %v1882_v4  ;;  %3027 = vmatprep.subr.bf16.mxu0 %v3026_v40  ;;  %3046 = vmatprep.subr.bf16.mxu1 %v3026_v40 }
 0x19a   : > { %v3030_v45 = vpack.c.bf16 %v1907_v5, %v1906_v27  ;;  %3029 = vmatpush3.bf16.msra.mxu0 %v3026_v40  ;;  %3054 = vmatpush3.bf16.msra.mxu1 %v3026_v40  ;;  %v1850_v28 = vpop.permute.xlu1 %1849  ;;  %v1848_v46 = vpop.permute.xlu0 %1847 }
 0x19b   : > { %v1885_v47 = vsel %vm1871_vm7, %v1850_v28, 0.0  ;;  %v1884_v48 = vsel %vm1871_vm7, %v1848_v46, 0.0 }
 0x19c   : > { %v1909_v49 = vmul.f32 %v3874_v22, %v1885_v47  ;;  %v1908_v50 = vmul.f32 %v3874_v22, %v1884_v48  ;;  %3031 = vmatprep.subr.bf16.mxu0 %v3030_v45  ;;  %3047 = vmatprep.subr.bf16.mxu1 %v3030_v45 }
 0x19e   : > { %v3034_v51 = vpack.c.bf16 %v1909_v49, %v1908_v50  ;;  %3033 = vmatpush3.bf16.msra.mxu0 %v3030_v45  ;;  %3055 = vmatpush3.bf16.msra.mxu1 %v3030_v45  ;;  %v1854_v52 = vpop.permute.xlu1 %1853  ;;  %v1852_v41 = vpop.permute.xlu0 %1851 }
 0x19f   : > { %v1887_v55 = vsel %vm1871_vm7, %v1854_v52, 0.0  ;;  %v1886_v56 = vsel %vm1871_vm7, %v1852_v41, 0.0 }
 0x1a0   : > { %v1911_v57 = vmul.f32 %v3874_v22, %v1887_v55  ;;  %v1910_v54 = vmul.f32 %v3874_v22, %v1886_v56  ;;  %3035 = vmatprep.subr.bf16.mxu0 %v3034_v51  ;;  %3048 = vmatprep.subr.bf16.mxu1 %v3034_v51 }
 0x1a2   : > { %v3038_v12 = vpack.c.bf16 %v1911_v57, %v1910_v54  ;;  %3037 = vmatpush3.bf16.msra.mxu0 %v3034_v51  ;;  %3056 = vmatpush3.bf16.msra.mxu1 %v3034_v51 }
 0x1a4   : > { %3039 = vmatprep.subr.bf16.mxu0 %v3038_v12  ;;  %3049 = vmatprep.subr.bf16.mxu1 %v3038_v12 }
 0x1a6   : > { %3041 = vmatpush3.bf16.msra.mxu0 %v3038_v12  ;;  %3057 = vmatpush3.bf16.msra.mxu1 %v3038_v12 }
 0x1a9   : > { %2743 = vmatmul.mubr.f32.vlgmr.msra.gmra.mrb[0].mxu0 %v1914_v13  ;;  %2749 = vmatmul.mubr.f32.vlgmr.msra.gmra.mrb[8].mxu1 %v1918_v58 }
 0x1aa   : > { %2745 = vmatprep.mubr.f32.mxu0 %v1915_v59  ;;  %2751 = vmatprep.mubr.f32.mxu1 %v1919_v61 }
 0x1ad   : > { %2746 = vmatmul.mubr.f32.gmra.mrb[2].mxu0 %v1916_v62  ;;  %2752 = vmatmul.mubr.f32.gmra.mrb[10].mxu1 %v1920_v63 }
 0x257   : > { %v2524_v22 = vpop.f32.mrb[0].mxu1 }
 0x258   : > { %v997_v6 = vpop.f32.mrb[1].mxu1 }
 0x25b   : > { %v2527_v32 = vpop.f32.mrb[2].mxu1 }
 0x25c   : > { %v1007_v33 = vpop.f32.mrb[3].mxu1 }
 0x25f   : > { %v2530_v53 = vpop.f32.mrb[4].mxu1 }
 0x260   : > { %v1017_v7 = vpop.f32.mrb[5].mxu1 }
 0x263   : > { %v2533_v9 = vpop.f32.mrb[6].mxu1  ;;  %v2706_v10 = vpop.f32.mrb[4].mxu0 }
 0x264   : > { %v3062_v11 = vadd.f32 %v2706_v10, %v2530_v53  ;;  %v1027_v14 = vpop.f32.mrb[7].mxu1  ;;  %v1796_v17 = vpop.f32.mrb[5].mxu0 }
 0x265   : > { %v3064_v18 = vadd.f32 %v1796_v17, %v1017_v7 }
 0x267   : > { %v2709_v3 = vpop.f32.mrb[6].mxu0 }
 0x268   : > { %v3066_v15 = vadd.f32 %v2709_v3, %v2533_v9  ;;  %v1806_v1 = vpop.f32.mrb[7].mxu0 }
 0x269   : > { %v3068_v16 = vadd.f32 %v1806_v1, %v1027_v14 }
 0x27c   : > { %v2744_v19 = vpop.f32.mrb[0].mxu0  ;;  %v2750_v20 = vpop.f32.mrb[8].mxu1 }
 0x27d   : > { %v3058_v21 = vadd.f32 %v2744_v19, %v2524_v22  ;;  %v3063_v24 = vadd.f32 %v3062_v11, %v2750_v20  ;;  %v1987_v25 = vpop.f32.mrb[1].mxu0  ;;  %v2007_v26 = vpop.f32.mrb[9].mxu1 }
 0x27e   : > { %v3059_v2 = vadd.f32 %v1987_v25, %v997_v6  ;;  %v3065_v0 = vadd.f32 %v3064_v18, %v2007_v26 }
 0x27f   : > { %2036 = vst.msk [vmem:[%s185_s11 + $0x8] sm:$0xff] %vm2034_vm8, %v3058_v21  ;;  %2040 = vst.msk [vmem:[%s185_s11 + $0x28] sm:$0xff] %vm2034_vm8, %v3063_v24 }
 0x280   : > { %2035 = vst.msk [vmem:[%s185_s11] sm:$0xff] %vm2034_vm8, %v3059_v2  ;;  %2039 = vst.msk [vmem:[%s185_s11 + $0x20] sm:$0xff] %vm2034_vm8, %v3065_v0  ;;  %v2747_v29 = vpop.f32.mrb[2].mxu0  ;;  %v2753_v30 = vpop.f32.mrb[10].mxu1 }
 0x281   : > { %v3060_v31 = vadd.f32 %v2747_v29, %v2527_v32  ;;  %v3067_v34 = vadd.f32 %v3066_v15, %v2753_v30  ;;  %v1997_v23 = vpop.f32.mrb[3].mxu0  ;;  %v2017_v60 = vpop.f32.mrb[11].mxu1 }
 0x282   : > { %v3061_v35 = vadd.f32 %v1997_v23, %v1007_v33  ;;  %v3069_v36 = vadd.f32 %v3068_v16, %v2017_v60 }
 0x283   : > { %2038 = vst.msk [vmem:[%s185_s11 + $0x18] sm:$0xff] %vm2034_vm8, %v3060_v31  ;;  %2042 = vst.msk [vmem:[%s185_s11 + $0x38] sm:$0xff] %vm2034_vm8, %v3067_v34 }
 0x284   : > { %2037 = vst.msk [vmem:[%s185_s11 + $0x10] sm:$0xff] %vm2034_vm8, %v3061_v35  ;;  %2041 = vst.msk [vmem:[%s185_s11 + $0x30] sm:$0xff] %vm2034_vm8, %v3069_v36 }
 0x285 PF: > { %s14_s12 = sadd.s32 1, %s3201_s12  }
 0x286   : > { %p11_p3 = scmp.ge.s32.totalorder %s14_s12, 4  }
 0x288   :  { %13 = sbr.rel (!%p11_p3) target bundleno = 1 (0x1), region = 83 }
 0x28f   :  { %2064 = vsyncpa [#allocation3], 1 }
 0x290   :  { %2066 = vsyncpa [#allocation3 + $0x1], 1 }

</bundles_post_ra>
